<compile_context>
chip_gen: v7x
topology: tpu7x:2x2x1
jax: 0.10.0
libtpu: 0.0.40
codegen_flags: <defaults>
</compile_context>

<pallas_src>
import functools

import jax
import jax.numpy as jnp
from jax.experimental import pallas as pl
from jax.experimental.pallas import tpu as pltpu


# ----------------------------------------------------------------------------
# Pallas kernel
# ----------------------------------------------------------------------------
def ctlstm_kernel(
    x_ref,      # (T*Bp, D)  time-major input, batch padded to Bp rows per step
    wlag_ref,   # (T*Bp, 1)  wlag[t] repeated per padded batch row
    wih0_ref,   # (D, 4H)    weight_ih_l0^T, rows pre-scaled by wfeat*scale,
                #            gate columns permuted to [i, f, o, g]
    whh0_ref,   # (H, 4H)    weight_hh_l0^T, permuted
    b0_ref,     # (1, 4H)    b_ih_l0 + b_hh_l0, permuted
    wih1_ref,   # (H, 4H)    weight_ih_l1^T, permuted
    whh1_ref,   # (H, 4H)    weight_hh_l1^T, permuted
    b1_ref,     # (1, 4H)    b_ih_l1 + b_hh_l1, permuted
    wfc_ref,    # (T*H, O)   fc.weight^T
    bfc_ref,    # (1, O)     fc.bias
    out_ref,    # (Bp, O)
    hn_ref,     # (2, Bp, H) final h per layer
    cn_ref,     # (2, Bp, H) final c per layer
    *,
    Bp,
    T,
):
    H = whh0_ref.shape[0]
    O = wfc_ref.shape[1]

    # --- per-timestep lag scale (single broadcast vmul over (T*Bp, D)) ------
    xm = x_ref[...] * wlag_ref[...]                                # (T*Bp, D)

    # --- hoisted layer-0 input projection: one matmul for all timesteps -----
    # (wfeat * norm scale already folded into wih0 columns' rows)
    g0_pre = (
        jnp.dot(xm, wih0_ref[...], preferred_element_type=jnp.float32)
        + b0_ref[...]
    )                                                              # (T*Bp, 4H)

    whh0 = whh0_ref[...]
    wih1 = wih1_ref[...]
    whh1 = whh1_ref[...]
    b1 = b1_ref[...]

    def cell(gates, c):
        # Gate columns are [i, f, o | g]: sigmoid on 3H cols, tanh on H cols.
        sg = jax.nn.sigmoid(gates[:, : 3 * H])
        gg = jnp.tanh(gates[:, 3 * H:])
        i_g = sg[:, 0 * H:1 * H]
        f_g = sg[:, 1 * H:2 * H]
        o_g = sg[:, 2 * H:3 * H]
        c = f_g * c + i_g * gg
        h = o_g * jnp.tanh(c)
        return h, c

    h0 = jnp.zeros((Bp, H), jnp.float32)
    c0 = jnp.zeros((Bp, H), jnp.float32)
    h1 = jnp.zeros((Bp, H), jnp.float32)
    c1 = jnp.zeros((Bp, H), jnp.float32)
    out_acc = jnp.zeros((Bp, O), jnp.float32)

    # --- wavefronted recurrence ----------------------------------------------
    # Iteration i: layer-0 step i and layer-1 step i-1.  Both only read
    # h0_{i-1} (h0_prev), so the two matmul->EUP->vmul chains are independent
    # within an iteration and can overlap.
    # TODO(synk): for large T switch to lax.fori_loop(unroll=k) over a VMEM-
    # resident g0_pre to bound vreg live ranges.
    for i in range(T + 1):
        h0_prev = h0
        if i < T:  # layer-0 step i
            gates0 = g0_pre[i * Bp:(i + 1) * Bp, :] + jnp.dot(
                h0_prev, whh0, preferred_element_type=jnp.float32
            )
            h0, c0 = cell(gates0, c0)
        if i >= 1:  # layer-1 step i-1 (input h0_{i-1}) + folded FC accumulate
            gates1 = (
                jnp.dot(h0_prev, wih1, preferred_element_type=jnp.float32)
                + jnp.dot(h1, whh1, preferred_element_type=jnp.float32)
                + b1
            )
            h1, c1 = cell(gates1, c1)
            out_acc = out_acc + jnp.dot(
                h1, wfc_ref[pl.ds((i - 1) * H, H), :],
                preferred_element_type=jnp.float32,
            )

    out_ref[...] = out_acc + bfc_ref[...]
    hn_ref[0, :, :] = h0
    hn_ref[1, :, :] = h1
    cn_ref[0, :, :] = c0
    cn_ref[1, :, :] = c1


# ----------------------------------------------------------------------------
# Wrapper (layout plumbing + parameter-sized preprocessing only)
# ----------------------------------------------------------------------------
def ctlstm_forward(x, params):
    # TODO(synk): only the default `hidden=None` (zero initial state) path is
    # implemented; a user-supplied hidden state is not plumbed into the kernel.
    B, T, D = x.shape
    H = params["whh0"].shape[1]
    O = params["wfc"].shape[0]
    Bp = ((B + 7) // 8) * 8   # pad batch rows to the sublane tile (8)

    def permute_gates(w):
        # PyTorch gate order along the 4H axis is [i, f, g, o]; reorder the
        # columns to [i, f, o, g] so sigmoid/tanh split cleanly in the kernel.
        return jnp.concatenate(
            [w[..., : 2 * H], w[..., 3 * H: 4 * H], w[..., 2 * H: 3 * H]],
            axis=-1,
        )

    # norm_const / ||W_ih_l0|| normalization folded with wfeat into W_ih_l0^T.
    scale = params["norm_const"] / jnp.linalg.norm(params["wih0"])
    wih0_t = params["wih0"].T.astype(jnp.float32) * (
        params["wfeat"].astype(jnp.float32).reshape(D, 1) * scale
    )
    wih0_t = permute_gates(wih0_t)                                  # (D, 4H)
    whh0_t = permute_gates(params["whh0"].T.astype(jnp.float32))    # (H, 4H)
    b0 = permute_gates(
        (params["bih0"] + params["bhh0"]).astype(jnp.float32).reshape(1, 4 * H)
    )
    wih1_t = permute_gates(params["wih1"].T.astype(jnp.float32))    # (H, 4H)
    whh1_t = permute_gates(params["whh1"].T.astype(jnp.float32))    # (H, 4H)
    b1 = permute_gates(
        (params["bih1"] + params["bhh1"]).astype(jnp.float32).reshape(1, 4 * H)
    )

    # Tiny per-row lag scale (T*Bp, 1): row r = t*Bp + b holds wlag[t].
    wlag_rows = jnp.repeat(
        params["wlag"].astype(jnp.float32).reshape(T, 1), Bp, axis=0
    )

    # Time-major, batch-padded layout: row r = t*Bp + b holds x[b, t, :]
    # (zero-filled for b >= B; padded rows are independent and discarded).
    x_tm = jnp.transpose(x.astype(jnp.float32), (1, 0, 2))          # (T, B, D)
    x_pad = (
        jnp.zeros((T, Bp, D), jnp.float32).at[:, :B, :].set(x_tm)
    ).reshape(T * Bp, D)

    vmem = pl.BlockSpec(memory_space=pltpu.MemorySpace.VMEM)
    kernel = functools.partial(ctlstm_kernel, Bp=Bp, T=T)

    out_p, hn_p, cn_p = pl.pallas_call(
        kernel,
        out_shape=(
            jax.ShapeDtypeStruct((Bp, O), jnp.float32),
            jax.ShapeDtypeStruct((2, Bp, H), jnp.float32),
            jax.ShapeDtypeStruct((2, Bp, H), jnp.float32),
        ),
        in_specs=[vmem] * 10,
        out_specs=(vmem, vmem, vmem),
    )(
        x_pad,
        wlag_rows,
        wih0_t,
        whh0_t,
        b0,
        wih1_t,
        whh1_t,
        b1,
        params["wfc"].T.astype(jnp.float32),                        # (T*H, O)
        params["bfc"].astype(jnp.float32).reshape(1, O),
    )
    # Drop the batch padding.
    return out_p[:B], (hn_p[:, :B, :], cn_p[:, :B, :])


# ----------------------------------------------------------------------------
# Pure-JAX reference (for correctness check only)
# ----------------------------------------------------------------------------
def ctlstm_reference(x, params):
    B, T, D = x.shape
    H = params["whh0"].shape[1]
    scale = params["norm_const"] / jnp.linalg.norm(params["wih0"])
    xf = x * params["wfeat"][None, None, :] * params["wlag"][None, :, :] * scale

    def run_layer(xs, wih, whh, bih, bhh):
        h = jnp.zeros((B, H), jnp.float32)
        c = jnp.zeros((B, H), jnp.float32)
        outs = []
        for t in range(T):
            g = xs[:, t, :] @ wih.T + bih + h @ whh.T + bhh
            i = jax.nn.sigmoid(g[:, :H])
            f = jax.nn.sigmoid(g[:, H:2 * H])
            gg = jnp.tanh(g[:, 2 * H:3 * H])
            o = jax.nn.sigmoid(g[:, 3 * H:])
            c = f * c + i * gg
            h = o * jnp.tanh(c)
            outs.append(h)
        return jnp.stack(outs, axis=1), h, c

    s0, h0, c0 = run_layer(xf, params["wih0"], params["whh0"],
                           params["bih0"], params["bhh0"])
    s1, h1, c1 = run_layer(s0, params["wih1"], params["whh1"],
                           params["bih1"], params["bhh1"])
    out = s1.reshape(B, T * H) @ params["wfc"].T + params["bfc"]
    return out, (jnp.stack([h0, h1]), jnp.stack([c0, c1]))


# ----------------------------------------------------------------------------
if __name__ == "__main__":
    input_size, seq_len, hidden_dim, n_layers, output_size = 8, 8, 16, 2, 1
    batch = 2

    key = jax.random.PRNGKey(0)
    keys = jax.random.split(key, 16)
    k = 1.0 / jnp.sqrt(hidden_dim)

    def u(kk, shape, bound):
        return jax.random.uniform(kk, shape, jnp.float32, -bound, bound)

    params = {
        # trainable element-wise filters
        "wfeat": u(keys[0], (input_size,), 1.0),
        "wlag": u(keys[1], (seq_len, 1), 1.0),
        # LSTM layer 0
        "wih0": u(keys[2], (4 * hidden_dim, input_size), k),
        "whh0": u(keys[3], (4 * hidden_dim, hidden_dim), k),
        "bih0": u(keys[4], (4 * hidden_dim,), k),
        "bhh0": u(keys[5], (4 * hidden_dim,), k),
        # LSTM layer 1
        "wih1": u(keys[6], (4 * hidden_dim, hidden_dim), k),
        "whh1": u(keys[7], (4 * hidden_dim, hidden_dim), k),
        "bih1": u(keys[8], (4 * hidden_dim,), k),
        "bhh1": u(keys[9], (4 * hidden_dim,), k),
        # final Linear(hidden_dim * seq_len, output_size)
        "wfc": u(keys[10], (output_size, hidden_dim * seq_len),
                 1.0 / jnp.sqrt(hidden_dim * seq_len)),
        "bfc": u(keys[11], (output_size,),
                 1.0 / jnp.sqrt(hidden_dim * seq_len)),
    }
    params["norm_const"] = jnp.linalg.norm(params["wih0"])

    x = jax.random.normal(keys[12], (batch, seq_len, input_size), jnp.float32)

    out, (hn, cn) = ctlstm_forward(x, params)
    jax.block_until_ready((out, hn, cn))

    ref_out, (ref_hn, ref_cn) = ctlstm_reference(x, params)
    assert out.shape == (batch, output_size)
    assert hn.shape == (n_layers, batch, hidden_dim)
    assert cn.shape == (n_layers, batch, hidden_dim)
    assert jnp.allclose(out, ref_out, atol=1e-3, rtol=1e-3)
    assert jnp.allclose(hn, ref_hn, atol=1e-3, rtol=1e-3)
    assert jnp.allclose(cn, ref_cn, atol=1e-3, rtol=1e-3)

    print("KERNEL_OK")
</pallas_src>

<mosaic_0001>
module attributes {stable_mosaic.version = 11 : i64} {
  func.func @ctlstm_kernel(%arg0: memref<64x8xf32, #tpu.memory_space<vmem>>, %arg1: memref<64x1xf32, #tpu.memory_space<vmem>>, %arg2: memref<8x64xf32, #tpu.memory_space<vmem>>, %arg3: memref<16x64xf32, #tpu.memory_space<vmem>>, %arg4: memref<1x64xf32, #tpu.memory_space<vmem>>, %arg5: memref<16x64xf32, #tpu.memory_space<vmem>>, %arg6: memref<16x64xf32, #tpu.memory_space<vmem>>, %arg7: memref<1x64xf32, #tpu.memory_space<vmem>>, %arg8: memref<128x1xf32, #tpu.memory_space<vmem>>, %arg9: memref<1x1xf32, #tpu.memory_space<vmem>>, %arg10: memref<8x1xf32, #tpu.memory_space<vmem>>, %arg11: memref<2x8x16xf32, #tpu.memory_space<vmem>>, %arg12: memref<2x8x16xf32, #tpu.memory_space<vmem>>) attributes {dimension_semantics = [], scalar_prefetch = 0 : i64, scratch_operands = 0 : i64, tpu.core_type = #tpu.core_type<tc>} {
    %c0 = arith.constant 0 : index
    %c0_0 = arith.constant 0 : index
    %0 = vector.load %arg0[%c0, %c0_0] : memref<64x8xf32, #tpu.memory_space<vmem>>, vector<64x8xf32>
    %c0_1 = arith.constant 0 : index
    %c0_2 = arith.constant 0 : index
    %1 = vector.load %arg1[%c0_1, %c0_2] : memref<64x1xf32, #tpu.memory_space<vmem>>, vector<64x1xf32>
    %2 = vector.broadcast %1 : vector<64x1xf32> to vector<64x8xf32>
    %3 = arith.mulf %0, %2 : vector<64x8xf32>
    %c0_3 = arith.constant 0 : index
    %c0_4 = arith.constant 0 : index
    %4 = vector.load %arg2[%c0_3, %c0_4] : memref<8x64xf32, #tpu.memory_space<vmem>>, vector<8x64xf32>
    %cst = arith.constant dense<0.000000e+00> : vector<64x64xf32>
    %5 = tpu.matmul %3, %4, %cst {dimension_numbers = #tpu.dot_dimension_numbers<[1], [0], [0], [1], [0, 0, 1, 1], [], []>} : vector<64x8xf32>, vector<8x64xf32>, vector<64x64xf32> -> vector<64x64xf32>
    %c0_5 = arith.constant 0 : index
    %c0_6 = arith.constant 0 : index
    %6 = vector.load %arg4[%c0_5, %c0_6] : memref<1x64xf32, #tpu.memory_space<vmem>>, vector<1x64xf32>
    %7 = vector.broadcast %6 : vector<1x64xf32> to vector<64x64xf32>
    %8 = arith.addf %5, %7 : vector<64x64xf32>
    %c0_7 = arith.constant 0 : index
    %c0_8 = arith.constant 0 : index
    %9 = vector.load %arg3[%c0_7, %c0_8] : memref<16x64xf32, #tpu.memory_space<vmem>>, vector<16x64xf32>
    %c0_9 = arith.constant 0 : index
    %c0_10 = arith.constant 0 : index
    %10 = vector.load %arg5[%c0_9, %c0_10] : memref<16x64xf32, #tpu.memory_space<vmem>>, vector<16x64xf32>
    %c0_11 = arith.constant 0 : index
    %c0_12 = arith.constant 0 : index
    %11 = vector.load %arg6[%c0_11, %c0_12] : memref<16x64xf32, #tpu.memory_space<vmem>>, vector<16x64xf32>
    %c0_13 = arith.constant 0 : index
    %c0_14 = arith.constant 0 : index
    %12 = vector.load %arg7[%c0_13, %c0_14] : memref<1x64xf32, #tpu.memory_space<vmem>>, vector<1x64xf32>
    %cst_15 = arith.constant 0.000000e+00 : f32
    %13 = vector.broadcast %cst_15 : f32 to vector<8x16xf32>
    %cst_16 = arith.constant 0.000000e+00 : f32
    %14 = vector.broadcast %cst_16 : f32 to vector<8x16xf32>
    %cst_17 = arith.constant 0.000000e+00 : f32
    %15 = vector.broadcast %cst_17 : f32 to vector<8x16xf32>
    %cst_18 = arith.constant 0.000000e+00 : f32
    %16 = vector.broadcast %cst_18 : f32 to vector<8x16xf32>
    %cst_19 = arith.constant 0.000000e+00 : f32
    %17 = vector.broadcast %cst_19 : f32 to vector<8x1xf32>
    %18 = vector.extract_strided_slice %8 {offsets = [0, 0], sizes = [8, 64], strides = [1, 1]} : vector<64x64xf32> to vector<8x64xf32>
    %cst_20 = arith.constant dense<0.000000e+00> : vector<8x64xf32>
    %19 = tpu.matmul %13, %9, %cst_20 {dimension_numbers = #tpu.dot_dimension_numbers<[1], [0], [0], [1], [0, 0, 1, 1], [], []>} : vector<8x16xf32>, vector<16x64xf32>, vector<8x64xf32> -> vector<8x64xf32>
    %20 = arith.addf %18, %19 : vector<8x64xf32>
    %21 = vector.extract_strided_slice %20 {offsets = [0, 0], sizes = [8, 48], strides = [1, 1]} : vector<8x64xf32> to vector<8x48xf32>
    %22 = arith.negf %21 : vector<8x48xf32>
    %23 = math.exp %22 : vector<8x48xf32>
    %cst_21 = arith.constant 1.000000e+00 : f32
    %24 = vector.broadcast %cst_21 : f32 to vector<8x48xf32>
    %25 = arith.addf %24, %23 : vector<8x48xf32>
    %26 = arith.divf %24, %25 : vector<8x48xf32>
    %27 = vector.extract_strided_slice %20 {offsets = [0, 48], sizes = [8, 16], strides = [1, 1]} : vector<8x64xf32> to vector<8x16xf32>
    %28 = math.tanh %27 : vector<8x16xf32>
    %29 = vector.extract_strided_slice %26 {offsets = [0, 0], sizes = [8, 16], strides = [1, 1]} : vector<8x48xf32> to vector<8x16xf32>
    %30 = vector.extract_strided_slice %26 {offsets = [0, 16], sizes = [8, 16], strides = [1, 1]} : vector<8x48xf32> to vector<8x16xf32>
    %31 = vector.extract_strided_slice %26 {offsets = [0, 32], sizes = [8, 16], strides = [1, 1]} : vector<8x48xf32> to vector<8x16xf32>
    %32 = arith.mulf %30, %14 : vector<8x16xf32>
    %33 = arith.mulf %29, %28 : vector<8x16xf32>
    %34 = arith.addf %32, %33 : vector<8x16xf32>
    %35 = math.tanh %34 : vector<8x16xf32>
    %36 = arith.mulf %31, %35 : vector<8x16xf32>
    %37 = vector.extract_strided_slice %8 {offsets = [8, 0], sizes = [8, 64], strides = [1, 1]} : vector<64x64xf32> to vector<8x64xf32>
    %cst_22 = arith.constant dense<0.000000e+00> : vector<8x64xf32>
    %38 = tpu.matmul %36, %9, %cst_22 {dimension_numbers = #tpu.dot_dimension_numbers<[1], [0], [0], [1], [0, 0, 1, 1], [], []>} : vector<8x16xf32>, vector<16x64xf32>, vector<8x64xf32> -> vector<8x64xf32>
    %39 = arith.addf %37, %38 : vector<8x64xf32>
    %40 = vector.extract_strided_slice %39 {offsets = [0, 0], sizes = [8, 48], strides = [1, 1]} : vector<8x64xf32> to vector<8x48xf32>
    %41 = arith.negf %40 : vector<8x48xf32>
    %42 = math.exp %41 : vector<8x48xf32>
    %cst_23 = arith.constant 1.000000e+00 : f32
    %43 = vector.broadcast %cst_23 : f32 to vector<8x48xf32>
    %44 = arith.addf %43, %42 : vector<8x48xf32>
    %45 = arith.divf %43, %44 : vector<8x48xf32>
    %46 = vector.extract_strided_slice %39 {offsets = [0, 48], sizes = [8, 16], strides = [1, 1]} : vector<8x64xf32> to vector<8x16xf32>
    %47 = math.tanh %46 : vector<8x16xf32>
    %48 = vector.extract_strided_slice %45 {offsets = [0, 0], sizes = [8, 16], strides = [1, 1]} : vector<8x48xf32> to vector<8x16xf32>
    %49 = vector.extract_strided_slice %45 {offsets = [0, 16], sizes = [8, 16], strides = [1, 1]} : vector<8x48xf32> to vector<8x16xf32>
    %50 = vector.extract_strided_slice %45 {offsets = [0, 32], sizes = [8, 16], strides = [1, 1]} : vector<8x48xf32> to vector<8x16xf32>
    %51 = arith.mulf %49, %34 : vector<8x16xf32>
    %52 = arith.mulf %48, %47 : vector<8x16xf32>
    %53 = arith.addf %51, %52 : vector<8x16xf32>
    %54 = math.tanh %53 : vector<8x16xf32>
    %55 = arith.mulf %50, %54 : vector<8x16xf32>
    %cst_24 = arith.constant dense<0.000000e+00> : vector<8x64xf32>
    %56 = tpu.matmul %36, %10, %cst_24 {dimension_numbers = #tpu.dot_dimension_numbers<[1], [0], [0], [1], [0, 0, 1, 1], [], []>} : vector<8x16xf32>, vector<16x64xf32>, vector<8x64xf32> -> vector<8x64xf32>
    %cst_25 = arith.constant dense<0.000000e+00> : vector<8x64xf32>
    %57 = tpu.matmul %15, %11, %cst_25 {dimension_numbers = #tpu.dot_dimension_numbers<[1], [0], [0], [1], [0, 0, 1, 1], [], []>} : vector<8x16xf32>, vector<16x64xf32>, vector<8x64xf32> -> vector<8x64xf32>
    %58 = arith.addf %56, %57 : vector<8x64xf32>
    %59 = vector.broadcast %12 : vector<1x64xf32> to vector<8x64xf32>
    %60 = arith.addf %58, %59 : vector<8x64xf32>
    %61 = vector.extract_strided_slice %60 {offsets = [0, 0], sizes = [8, 48], strides = [1, 1]} : vector<8x64xf32> to vector<8x48xf32>
    %62 = arith.negf %61 : vector<8x48xf32>
    %63 = math.exp %62 : vector<8x48xf32>
    %cst_26 = arith.constant 1.000000e+00 : f32
    %64 = vector.broadcast %cst_26 : f32 to vector<8x48xf32>
    %65 = arith.addf %64, %63 : vector<8x48xf32>
    %66 = arith.divf %64, %65 : vector<8x48xf32>
    %67 = vector.extract_strided_slice %60 {offsets = [0, 48], sizes = [8, 16], strides = [1, 1]} : vector<8x64xf32> to vector<8x16xf32>
    %68 = math.tanh %67 : vector<8x16xf32>
    %69 = vector.extract_strided_slice %66 {offsets = [0, 0], sizes = [8, 16], strides = [1, 1]} : vector<8x48xf32> to vector<8x16xf32>
    %70 = vector.extract_strided_slice %66 {offsets = [0, 16], sizes = [8, 16], strides = [1, 1]} : vector<8x48xf32> to vector<8x16xf32>
    %71 = vector.extract_strided_slice %66 {offsets = [0, 32], sizes = [8, 16], strides = [1, 1]} : vector<8x48xf32> to vector<8x16xf32>
    %72 = arith.mulf %70, %16 : vector<8x16xf32>
    %73 = arith.mulf %69, %68 : vector<8x16xf32>
    %74 = arith.addf %72, %73 : vector<8x16xf32>
    %75 = math.tanh %74 : vector<8x16xf32>
    %76 = arith.mulf %71, %75 : vector<8x16xf32>
    %c0_27 = arith.constant 0 : index
    %c0_28 = arith.constant 0 : index
    %77 = vector.load %arg8[%c0_27, %c0_28] : memref<128x1xf32, #tpu.memory_space<vmem>>, vector<16x1xf32>
    %cst_29 = arith.constant dense<0.000000e+00> : vector<8x1xf32>
    %78 = tpu.matmul %76, %77, %cst_29 {dimension_numbers = #tpu.dot_dimension_numbers<[1], [0], [0], [1], [0, 0, 1, 1], [], []>} : vector<8x16xf32>, vector<16x1xf32>, vector<8x1xf32> -> vector<8x1xf32>
    %79 = arith.addf %17, %78 : vector<8x1xf32>
    %80 = vector.extract_strided_slice %8 {offsets = [16, 0], sizes = [8, 64], strides = [1, 1]} : vector<64x64xf32> to vector<8x64xf32>
    %cst_30 = arith.constant dense<0.000000e+00> : vector<8x64xf32>
    %81 = tpu.matmul %55, %9, %cst_30 {dimension_numbers = #tpu.dot_dimension_numbers<[1], [0], [0], [1], [0, 0, 1, 1], [], []>} : vector<8x16xf32>, vector<16x64xf32>, vector<8x64xf32> -> vector<8x64xf32>
    %82 = arith.addf %80, %81 : vector<8x64xf32>
    %83 = vector.extract_strided_slice %82 {offsets = [0, 0], sizes = [8, 48], strides = [1, 1]} : vector<8x64xf32> to vector<8x48xf32>
    %84 = arith.negf %83 : vector<8x48xf32>
    %85 = math.exp %84 : vector<8x48xf32>
    %cst_31 = arith.constant 1.000000e+00 : f32
    %86 = vector.broadcast %cst_31 : f32 to vector<8x48xf32>
    %87 = arith.addf %86, %85 : vector<8x48xf32>
    %88 = arith.divf %86, %87 : vector<8x48xf32>
    %89 = vector.extract_strided_slice %82 {offsets = [0, 48], sizes = [8, 16], strides = [1, 1]} : vector<8x64xf32> to vector<8x16xf32>
    %90 = math.tanh %89 : vector<8x16xf32>
    %91 = vector.extract_strided_slice %88 {offsets = [0, 0], sizes = [8, 16], strides = [1, 1]} : vector<8x48xf32> to vector<8x16xf32>
    %92 = vector.extract_strided_slice %88 {offsets = [0, 16], sizes = [8, 16], strides = [1, 1]} : vector<8x48xf32> to vector<8x16xf32>
    %93 = vector.extract_strided_slice %88 {offsets = [0, 32], sizes = [8, 16], strides = [1, 1]} : vector<8x48xf32> to vector<8x16xf32>
    %94 = arith.mulf %92, %53 : vector<8x16xf32>
    %95 = arith.mulf %91, %90 : vector<8x16xf32>
    %96 = arith.addf %94, %95 : vector<8x16xf32>
    %97 = math.tanh %96 : vector<8x16xf32>
    %98 = arith.mulf %93, %97 : vector<8x16xf32>
    %cst_32 = arith.constant dense<0.000000e+00> : vector<8x64xf32>
    %99 = tpu.matmul %55, %10, %cst_32 {dimension_numbers = #tpu.dot_dimension_numbers<[1], [0], [0], [1], [0, 0, 1, 1], [], []>} : vector<8x16xf32>, vector<16x64xf32>, vector<8x64xf32> -> vector<8x64xf32>
    %cst_33 = arith.constant dense<0.000000e+00> : vector<8x64xf32>
    %100 = tpu.matmul %76, %11, %cst_33 {dimension_numbers = #tpu.dot_dimension_numbers<[1], [0], [0], [1], [0, 0, 1, 1], [], []>} : vector<8x16xf32>, vector<16x64xf32>, vector<8x64xf32> -> vector<8x64xf32>
    %101 = arith.addf %99, %100 : vector<8x64xf32>
    %102 = vector.broadcast %12 : vector<1x64xf32> to vector<8x64xf32>
    %103 = arith.addf %101, %102 : vector<8x64xf32>
    %104 = vector.extract_strided_slice %103 {offsets = [0, 0], sizes = [8, 48], strides = [1, 1]} : vector<8x64xf32> to vector<8x48xf32>
    %105 = arith.negf %104 : vector<8x48xf32>
    %106 = math.exp %105 : vector<8x48xf32>
    %cst_34 = arith.constant 1.000000e+00 : f32
    %107 = vector.broadcast %cst_34 : f32 to vector<8x48xf32>
    %108 = arith.addf %107, %106 : vector<8x48xf32>
    %109 = arith.divf %107, %108 : vector<8x48xf32>
    %110 = vector.extract_strided_slice %103 {offsets = [0, 48], sizes = [8, 16], strides = [1, 1]} : vector<8x64xf32> to vector<8x16xf32>
    %111 = math.tanh %110 : vector<8x16xf32>
    %112 = vector.extract_strided_slice %109 {offsets = [0, 0], sizes = [8, 16], strides = [1, 1]} : vector<8x48xf32> to vector<8x16xf32>
    %113 = vector.extract_strided_slice %109 {offsets = [0, 16], sizes = [8, 16], strides = [1, 1]} : vector<8x48xf32> to vector<8x16xf32>
    %114 = vector.extract_strided_slice %109 {offsets = [0, 32], sizes = [8, 16], strides = [1, 1]} : vector<8x48xf32> to vector<8x16xf32>
    %115 = arith.mulf %113, %74 : vector<8x16xf32>
    %116 = arith.mulf %112, %111 : vector<8x16xf32>
    %117 = arith.addf %115, %116 : vector<8x16xf32>
    %118 = math.tanh %117 : vector<8x16xf32>
    %119 = arith.mulf %114, %118 : vector<8x16xf32>
    %c16 = arith.constant 16 : index
    %c0_35 = arith.constant 0 : index
    %120 = vector.load %arg8[%c16, %c0_35] : memref<128x1xf32, #tpu.memory_space<vmem>>, vector<16x1xf32>
    %cst_36 = arith.constant dense<0.000000e+00> : vector<8x1xf32>
    %121 = tpu.matmul %119, %120, %cst_36 {dimension_numbers = #tpu.dot_dimension_numbers<[1], [0], [0], [1], [0, 0, 1, 1], [], []>} : vector<8x16xf32>, vector<16x1xf32>, vector<8x1xf32> -> vector<8x1xf32>
    %122 = arith.addf %79, %121 : vector<8x1xf32>
    %123 = vector.extract_strided_slice %8 {offsets = [24, 0], sizes = [8, 64], strides = [1, 1]} : vector<64x64xf32> to vector<8x64xf32>
    %cst_37 = arith.constant dense<0.000000e+00> : vector<8x64xf32>
    %124 = tpu.matmul %98, %9, %cst_37 {dimension_numbers = #tpu.dot_dimension_numbers<[1], [0], [0], [1], [0, 0, 1, 1], [], []>} : vector<8x16xf32>, vector<16x64xf32>, vector<8x64xf32> -> vector<8x64xf32>
    %125 = arith.addf %123, %124 : vector<8x64xf32>
    %126 = vector.extract_strided_slice %125 {offsets = [0, 0], sizes = [8, 48], strides = [1, 1]} : vector<8x64xf32> to vector<8x48xf32>
    %127 = arith.negf %126 : vector<8x48xf32>
    %128 = math.exp %127 : vector<8x48xf32>
    %cst_38 = arith.constant 1.000000e+00 : f32
    %129 = vector.broadcast %cst_38 : f32 to vector<8x48xf32>
    %130 = arith.addf %129, %128 : vector<8x48xf32>
    %131 = arith.divf %129, %130 : vector<8x48xf32>
    %132 = vector.extract_strided_slice %125 {offsets = [0, 48], sizes = [8, 16], strides = [1, 1]} : vector<8x64xf32> to vector<8x16xf32>
    %133 = math.tanh %132 : vector<8x16xf32>
    %134 = vector.extract_strided_slice %131 {offsets = [0, 0], sizes = [8, 16], strides = [1, 1]} : vector<8x48xf32> to vector<8x16xf32>
    %135 = vector.extract_strided_slice %131 {offsets = [0, 16], sizes = [8, 16], strides = [1, 1]} : vector<8x48xf32> to vector<8x16xf32>
    %136 = vector.extract_strided_slice %131 {offsets = [0, 32], sizes = [8, 16], strides = [1, 1]} : vector<8x48xf32> to vector<8x16xf32>
    %137 = arith.mulf %135, %96 : vector<8x16xf32>
    %138 = arith.mulf %134, %133 : vector<8x16xf32>
    %139 = arith.addf %137, %138 : vector<8x16xf32>
    %140 = math.tanh %139 : vector<8x16xf32>
    %141 = arith.mulf %136, %140 : vector<8x16xf32>
    %cst_39 = arith.constant dense<0.000000e+00> : vector<8x64xf32>
    %142 = tpu.matmul %98, %10, %cst_39 {dimension_numbers = #tpu.dot_dimension_numbers<[1], [0], [0], [1], [0, 0, 1, 1], [], []>} : vector<8x16xf32>, vector<16x64xf32>, vector<8x64xf32> -> vector<8x64xf32>
    %cst_40 = arith.constant dense<0.000000e+00> : vector<8x64xf32>
    %143 = tpu.matmul %119, %11, %cst_40 {dimension_numbers = #tpu.dot_dimension_numbers<[1], [0], [0], [1], [0, 0, 1, 1], [], []>} : vector<8x16xf32>, vector<16x64xf32>, vector<8x64xf32> -> vector<8x64xf32>
    %144 = arith.addf %142, %143 : vector<8x64xf32>
    %145 = vector.broadcast %12 : vector<1x64xf32> to vector<8x64xf32>
    %146 = arith.addf %144, %145 : vector<8x64xf32>
    %147 = vector.extract_strided_slice %146 {offsets = [0, 0], sizes = [8, 48], strides = [1, 1]} : vector<8x64xf32> to vector<8x48xf32>
    %148 = arith.negf %147 : vector<8x48xf32>
    %149 = math.exp %148 : vector<8x48xf32>
    %cst_41 = arith.constant 1.000000e+00 : f32
    %150 = vector.broadcast %cst_41 : f32 to vector<8x48xf32>
    %151 = arith.addf %150, %149 : vector<8x48xf32>
    %152 = arith.divf %150, %151 : vector<8x48xf32>
    %153 = vector.extract_strided_slice %146 {offsets = [0, 48], sizes = [8, 16], strides = [1, 1]} : vector<8x64xf32> to vector<8x16xf32>
    %154 = math.tanh %153 : vector<8x16xf32>
    %155 = vector.extract_strided_slice %152 {offsets = [0, 0], sizes = [8, 16], strides = [1, 1]} : vector<8x48xf32> to vector<8x16xf32>
    %156 = vector.extract_strided_slice %152 {offsets = [0, 16], sizes = [8, 16], strides = [1, 1]} : vector<8x48xf32> to vector<8x16xf32>
    %157 = vector.extract_strided_slice %152 {offsets = [0, 32], sizes = [8, 16], strides = [1, 1]} : vector<8x48xf32> to vector<8x16xf32>
    %158 = arith.mulf %156, %117 : vector<8x16xf32>
    %159 = arith.mulf %155, %154 : vector<8x16xf32>
    %160 = arith.addf %158, %159 : vector<8x16xf32>
    %161 = math.tanh %160 : vector<8x16xf32>
    %162 = arith.mulf %157, %161 : vector<8x16xf32>
    %c32 = arith.constant 32 : index
    %c0_42 = arith.constant 0 : index
    %163 = vector.load %arg8[%c32, %c0_42] : memref<128x1xf32, #tpu.memory_space<vmem>>, vector<16x1xf32>
    %cst_43 = arith.constant dense<0.000000e+00> : vector<8x1xf32>
    %164 = tpu.matmul %162, %163, %cst_43 {dimension_numbers = #tpu.dot_dimension_numbers<[1], [0], [0], [1], [0, 0, 1, 1], [], []>} : vector<8x16xf32>, vector<16x1xf32>, vector<8x1xf32> -> vector<8x1xf32>
    %165 = arith.addf %122, %164 : vector<8x1xf32>
    %166 = vector.extract_strided_slice %8 {offsets = [32, 0], sizes = [8, 64], strides = [1, 1]} : vector<64x64xf32> to vector<8x64xf32>
    %cst_44 = arith.constant dense<0.000000e+00> : vector<8x64xf32>
    %167 = tpu.matmul %141, %9, %cst_44 {dimension_numbers = #tpu.dot_dimension_numbers<[1], [0], [0], [1], [0, 0, 1, 1], [], []>} : vector<8x16xf32>, vector<16x64xf32>, vector<8x64xf32> -> vector<8x64xf32>
    %168 = arith.addf %166, %167 : vector<8x64xf32>
    %169 = vector.extract_strided_slice %168 {offsets = [0, 0], sizes = [8, 48], strides = [1, 1]} : vector<8x64xf32> to vector<8x48xf32>
    %170 = arith.negf %169 : vector<8x48xf32>
    %171 = math.exp %170 : vector<8x48xf32>
    %cst_45 = arith.constant 1.000000e+00 : f32
    %172 = vector.broadcast %cst_45 : f32 to vector<8x48xf32>
    %173 = arith.addf %172, %171 : vector<8x48xf32>
    %174 = arith.divf %172, %173 : vector<8x48xf32>
    %175 = vector.extract_strided_slice %168 {offsets = [0, 48], sizes = [8, 16], strides = [1, 1]} : vector<8x64xf32> to vector<8x16xf32>
    %176 = math.tanh %175 : vector<8x16xf32>
    %177 = vector.extract_strided_slice %174 {offsets = [0, 0], sizes = [8, 16], strides = [1, 1]} : vector<8x48xf32> to vector<8x16xf32>
    %178 = vector.extract_strided_slice %174 {offsets = [0, 16], sizes = [8, 16], strides = [1, 1]} : vector<8x48xf32> to vector<8x16xf32>
    %179 = vector.extract_strided_slice %174 {offsets = [0, 32], sizes = [8, 16], strides = [1, 1]} : vector<8x48xf32> to vector<8x16xf32>
    %180 = arith.mulf %178, %139 : vector<8x16xf32>
    %181 = arith.mulf %177, %176 : vector<8x16xf32>
    %182 = arith.addf %180, %181 : vector<8x16xf32>
    %183 = math.tanh %182 : vector<8x16xf32>
    %184 = arith.mulf %179, %183 : vector<8x16xf32>
    %cst_46 = arith.constant dense<0.000000e+00> : vector<8x64xf32>
    %185 = tpu.matmul %141, %10, %cst_46 {dimension_numbers = #tpu.dot_dimension_numbers<[1], [0], [0], [1], [0, 0, 1, 1], [], []>} : vector<8x16xf32>, vector<16x64xf32>, vector<8x64xf32> -> vector<8x64xf32>
    %cst_47 = arith.constant dense<0.000000e+00> : vector<8x64xf32>
    %186 = tpu.matmul %162, %11, %cst_47 {dimension_numbers = #tpu.dot_dimension_numbers<[1], [0], [0], [1], [0, 0, 1, 1], [], []>} : vector<8x16xf32>, vector<16x64xf32>, vector<8x64xf32> -> vector<8x64xf32>
    %187 = arith.addf %185, %186 : vector<8x64xf32>
    %188 = vector.broadcast %12 : vector<1x64xf32> to vector<8x64xf32>
    %189 = arith.addf %187, %188 : vector<8x64xf32>
    %190 = vector.extract_strided_slice %189 {offsets = [0, 0], sizes = [8, 48], strides = [1, 1]} : vector<8x64xf32> to vector<8x48xf32>
    %191 = arith.negf %190 : vector<8x48xf32>
    %192 = math.exp %191 : vector<8x48xf32>
    %cst_48 = arith.constant 1.000000e+00 : f32
    %193 = vector.broadcast %cst_48 : f32 to vector<8x48xf32>
    %194 = arith.addf %193, %192 : vector<8x48xf32>
    %195 = arith.divf %193, %194 : vector<8x48xf32>
    %196 = vector.extract_strided_slice %189 {offsets = [0, 48], sizes = [8, 16], strides = [1, 1]} : vector<8x64xf32> to vector<8x16xf32>
    %197 = math.tanh %196 : vector<8x16xf32>
    %198 = vector.extract_strided_slice %195 {offsets = [0, 0], sizes = [8, 16], strides = [1, 1]} : vector<8x48xf32> to vector<8x16xf32>
    %199 = vector.extract_strided_slice %195 {offsets = [0, 16], sizes = [8, 16], strides = [1, 1]} : vector<8x48xf32> to vector<8x16xf32>
    %200 = vector.extract_strided_slice %195 {offsets = [0, 32], sizes = [8, 16], strides = [1, 1]} : vector<8x48xf32> to vector<8x16xf32>
    %201 = arith.mulf %199, %160 : vector<8x16xf32>
    %202 = arith.mulf %198, %197 : vector<8x16xf32>
    %203 = arith.addf %201, %202 : vector<8x16xf32>
    %204 = math.tanh %203 : vector<8x16xf32>
    %205 = arith.mulf %200, %204 : vector<8x16xf32>
    %c48 = arith.constant 48 : index
    %c0_49 = arith.constant 0 : index
    %206 = vector.load %arg8[%c48, %c0_49] : memref<128x1xf32, #tpu.memory_space<vmem>>, vector<16x1xf32>
    %cst_50 = arith.constant dense<0.000000e+00> : vector<8x1xf32>
    %207 = tpu.matmul %205, %206, %cst_50 {dimension_numbers = #tpu.dot_dimension_numbers<[1], [0], [0], [1], [0, 0, 1, 1], [], []>} : vector<8x16xf32>, vector<16x1xf32>, vector<8x1xf32> -> vector<8x1xf32>
    %208 = arith.addf %165, %207 : vector<8x1xf32>
    %209 = vector.extract_strided_slice %8 {offsets = [40, 0], sizes = [8, 64], strides = [1, 1]} : vector<64x64xf32> to vector<8x64xf32>
    %cst_51 = arith.constant dense<0.000000e+00> : vector<8x64xf32>
    %210 = tpu.matmul %184, %9, %cst_51 {dimension_numbers = #tpu.dot_dimension_numbers<[1], [0], [0], [1], [0, 0, 1, 1], [], []>} : vector<8x16xf32>, vector<16x64xf32>, vector<8x64xf32> -> vector<8x64xf32>
    %211 = arith.addf %209, %210 : vector<8x64xf32>
    %212 = vector.extract_strided_slice %211 {offsets = [0, 0], sizes = [8, 48], strides = [1, 1]} : vector<8x64xf32> to vector<8x48xf32>
    %213 = arith.negf %212 : vector<8x48xf32>
    %214 = math.exp %213 : vector<8x48xf32>
    %cst_52 = arith.constant 1.000000e+00 : f32
    %215 = vector.broadcast %cst_52 : f32 to vector<8x48xf32>
    %216 = arith.addf %215, %214 : vector<8x48xf32>
    %217 = arith.divf %215, %216 : vector<8x48xf32>
    %218 = vector.extract_strided_slice %211 {offsets = [0, 48], sizes = [8, 16], strides = [1, 1]} : vector<8x64xf32> to vector<8x16xf32>
    %219 = math.tanh %218 : vector<8x16xf32>
    %220 = vector.extract_strided_slice %217 {offsets = [0, 0], sizes = [8, 16], strides = [1, 1]} : vector<8x48xf32> to vector<8x16xf32>
    %221 = vector.extract_strided_slice %217 {offsets = [0, 16], sizes = [8, 16], strides = [1, 1]} : vector<8x48xf32> to vector<8x16xf32>
    %222 = vector.extract_strided_slice %217 {offsets = [0, 32], sizes = [8, 16], strides = [1, 1]} : vector<8x48xf32> to vector<8x16xf32>
    %223 = arith.mulf %221, %182 : vector<8x16xf32>
    %224 = arith.mulf %220, %219 : vector<8x16xf32>
    %225 = arith.addf %223, %224 : vector<8x16xf32>
    %226 = math.tanh %225 : vector<8x16xf32>
    %227 = arith.mulf %222, %226 : vector<8x16xf32>
    %cst_53 = arith.constant dense<0.000000e+00> : vector<8x64xf32>
    %228 = tpu.matmul %184, %10, %cst_53 {dimension_numbers = #tpu.dot_dimension_numbers<[1], [0], [0], [1], [0, 0, 1, 1], [], []>} : vector<8x16xf32>, vector<16x64xf32>, vector<8x64xf32> -> vector<8x64xf32>
    %cst_54 = arith.constant dense<0.000000e+00> : vector<8x64xf32>
    %229 = tpu.matmul %205, %11, %cst_54 {dimension_numbers = #tpu.dot_dimension_numbers<[1], [0], [0], [1], [0, 0, 1, 1], [], []>} : vector<8x16xf32>, vector<16x64xf32>, vector<8x64xf32> -> vector<8x64xf32>
    %230 = arith.addf %228, %229 : vector<8x64xf32>
    %231 = vector.broadcast %12 : vector<1x64xf32> to vector<8x64xf32>
    %232 = arith.addf %230, %231 : vector<8x64xf32>
    %233 = vector.extract_strided_slice %232 {offsets = [0, 0], sizes = [8, 48], strides = [1, 1]} : vector<8x64xf32> to vector<8x48xf32>
    %234 = arith.negf %233 : vector<8x48xf32>
    %235 = math.exp %234 : vector<8x48xf32>
    %cst_55 = arith.constant 1.000000e+00 : f32
    %236 = vector.broadcast %cst_55 : f32 to vector<8x48xf32>
    %237 = arith.addf %236, %235 : vector<8x48xf32>
    %238 = arith.divf %236, %237 : vector<8x48xf32>
    %239 = vector.extract_strided_slice %232 {offsets = [0, 48], sizes = [8, 16], strides = [1, 1]} : vector<8x64xf32> to vector<8x16xf32>
    %240 = math.tanh %239 : vector<8x16xf32>
    %241 = vector.extract_strided_slice %238 {offsets = [0, 0], sizes = [8, 16], strides = [1, 1]} : vector<8x48xf32> to vector<8x16xf32>
    %242 = vector.extract_strided_slice %238 {offsets = [0, 16], sizes = [8, 16], strides = [1, 1]} : vector<8x48xf32> to vector<8x16xf32>
    %243 = vector.extract_strided_slice %238 {offsets = [0, 32], sizes = [8, 16], strides = [1, 1]} : vector<8x48xf32> to vector<8x16xf32>
    %244 = arith.mulf %242, %203 : vector<8x16xf32>
    %245 = arith.mulf %241, %240 : vector<8x16xf32>
    %246 = arith.addf %244, %245 : vector<8x16xf32>
    %247 = math.tanh %246 : vector<8x16xf32>
    %248 = arith.mulf %243, %247 : vector<8x16xf32>
    %c64 = arith.constant 64 : index
    %c0_56 = arith.constant 0 : index
    %249 = vector.load %arg8[%c64, %c0_56] : memref<128x1xf32, #tpu.memory_space<vmem>>, vector<16x1xf32>
    %cst_57 = arith.constant dense<0.000000e+00> : vector<8x1xf32>
    %250 = tpu.matmul %248, %249, %cst_57 {dimension_numbers = #tpu.dot_dimension_numbers<[1], [0], [0], [1], [0, 0, 1, 1], [], []>} : vector<8x16xf32>, vector<16x1xf32>, vector<8x1xf32> -> vector<8x1xf32>
    %251 = arith.addf %208, %250 : vector<8x1xf32>
    %252 = vector.extract_strided_slice %8 {offsets = [48, 0], sizes = [8, 64], strides = [1, 1]} : vector<64x64xf32> to vector<8x64xf32>
    %cst_58 = arith.constant dense<0.000000e+00> : vector<8x64xf32>
    %253 = tpu.matmul %227, %9, %cst_58 {dimension_numbers = #tpu.dot_dimension_numbers<[1], [0], [0], [1], [0, 0, 1, 1], [], []>} : vector<8x16xf32>, vector<16x64xf32>, vector<8x64xf32> -> vector<8x64xf32>
    %254 = arith.addf %252, %253 : vector<8x64xf32>
    %255 = vector.extract_strided_slice %254 {offsets = [0, 0], sizes = [8, 48], strides = [1, 1]} : vector<8x64xf32> to vector<8x48xf32>
    %256 = arith.negf %255 : vector<8x48xf32>
    %257 = math.exp %256 : vector<8x48xf32>
    %cst_59 = arith.constant 1.000000e+00 : f32
    %258 = vector.broadcast %cst_59 : f32 to vector<8x48xf32>
    %259 = arith.addf %258, %257 : vector<8x48xf32>
    %260 = arith.divf %258, %259 : vector<8x48xf32>
    %261 = vector.extract_strided_slice %254 {offsets = [0, 48], sizes = [8, 16], strides = [1, 1]} : vector<8x64xf32> to vector<8x16xf32>
    %262 = math.tanh %261 : vector<8x16xf32>
    %263 = vector.extract_strided_slice %260 {offsets = [0, 0], sizes = [8, 16], strides = [1, 1]} : vector<8x48xf32> to vector<8x16xf32>
    %264 = vector.extract_strided_slice %260 {offsets = [0, 16], sizes = [8, 16], strides = [1, 1]} : vector<8x48xf32> to vector<8x16xf32>
    %265 = vector.extract_strided_slice %260 {offsets = [0, 32], sizes = [8, 16], strides = [1, 1]} : vector<8x48xf32> to vector<8x16xf32>
    %266 = arith.mulf %264, %225 : vector<8x16xf32>
    %267 = arith.mulf %263, %262 : vector<8x16xf32>
    %268 = arith.addf %266, %267 : vector<8x16xf32>
    %269 = math.tanh %268 : vector<8x16xf32>
    %270 = arith.mulf %265, %269 : vector<8x16xf32>
    %cst_60 = arith.constant dense<0.000000e+00> : vector<8x64xf32>
    %271 = tpu.matmul %227, %10, %cst_60 {dimension_numbers = #tpu.dot_dimension_numbers<[1], [0], [0], [1], [0, 0, 1, 1], [], []>} : vector<8x16xf32>, vector<16x64xf32>, vector<8x64xf32> -> vector<8x64xf32>
    %cst_61 = arith.constant dense<0.000000e+00> : vector<8x64xf32>
    %272 = tpu.matmul %248, %11, %cst_61 {dimension_numbers = #tpu.dot_dimension_numbers<[1], [0], [0], [1], [0, 0, 1, 1], [], []>} : vector<8x16xf32>, vector<16x64xf32>, vector<8x64xf32> -> vector<8x64xf32>
    %273 = arith.addf %271, %272 : vector<8x64xf32>
    %274 = vector.broadcast %12 : vector<1x64xf32> to vector<8x64xf32>
    %275 = arith.addf %273, %274 : vector<8x64xf32>
    %276 = vector.extract_strided_slice %275 {offsets = [0, 0], sizes = [8, 48], strides = [1, 1]} : vector<8x64xf32> to vector<8x48xf32>
    %277 = arith.negf %276 : vector<8x48xf32>
    %278 = math.exp %277 : vector<8x48xf32>
    %cst_62 = arith.constant 1.000000e+00 : f32
    %279 = vector.broadcast %cst_62 : f32 to vector<8x48xf32>
    %280 = arith.addf %279, %278 : vector<8x48xf32>
    %281 = arith.divf %279, %280 : vector<8x48xf32>
    %282 = vector.extract_strided_slice %275 {offsets = [0, 48], sizes = [8, 16], strides = [1, 1]} : vector<8x64xf32> to vector<8x16xf32>
    %283 = math.tanh %282 : vector<8x16xf32>
    %284 = vector.extract_strided_slice %281 {offsets = [0, 0], sizes = [8, 16], strides = [1, 1]} : vector<8x48xf32> to vector<8x16xf32>
    %285 = vector.extract_strided_slice %281 {offsets = [0, 16], sizes = [8, 16], strides = [1, 1]} : vector<8x48xf32> to vector<8x16xf32>
    %286 = vector.extract_strided_slice %281 {offsets = [0, 32], sizes = [8, 16], strides = [1, 1]} : vector<8x48xf32> to vector<8x16xf32>
    %287 = arith.mulf %285, %246 : vector<8x16xf32>
    %288 = arith.mulf %284, %283 : vector<8x16xf32>
    %289 = arith.addf %287, %288 : vector<8x16xf32>
    %290 = math.tanh %289 : vector<8x16xf32>
    %291 = arith.mulf %286, %290 : vector<8x16xf32>
    %c80 = arith.constant 80 : index
    %c0_63 = arith.constant 0 : index
    %292 = vector.load %arg8[%c80, %c0_63] : memref<128x1xf32, #tpu.memory_space<vmem>>, vector<16x1xf32>
    %cst_64 = arith.constant dense<0.000000e+00> : vector<8x1xf32>
    %293 = tpu.matmul %291, %292, %cst_64 {dimension_numbers = #tpu.dot_dimension_numbers<[1], [0], [0], [1], [0, 0, 1, 1], [], []>} : vector<8x16xf32>, vector<16x1xf32>, vector<8x1xf32> -> vector<8x1xf32>
    %294 = arith.addf %251, %293 : vector<8x1xf32>
    %295 = vector.extract_strided_slice %8 {offsets = [56, 0], sizes = [8, 64], strides = [1, 1]} : vector<64x64xf32> to vector<8x64xf32>
    %cst_65 = arith.constant dense<0.000000e+00> : vector<8x64xf32>
    %296 = tpu.matmul %270, %9, %cst_65 {dimension_numbers = #tpu.dot_dimension_numbers<[1], [0], [0], [1], [0, 0, 1, 1], [], []>} : vector<8x16xf32>, vector<16x64xf32>, vector<8x64xf32> -> vector<8x64xf32>
    %297 = arith.addf %295, %296 : vector<8x64xf32>
    %298 = vector.extract_strided_slice %297 {offsets = [0, 0], sizes = [8, 48], strides = [1, 1]} : vector<8x64xf32> to vector<8x48xf32>
    %299 = arith.negf %298 : vector<8x48xf32>
    %300 = math.exp %299 : vector<8x48xf32>
    %cst_66 = arith.constant 1.000000e+00 : f32
    %301 = vector.broadcast %cst_66 : f32 to vector<8x48xf32>
    %302 = arith.addf %301, %300 : vector<8x48xf32>
    %303 = arith.divf %301, %302 : vector<8x48xf32>
    %304 = vector.extract_strided_slice %297 {offsets = [0, 48], sizes = [8, 16], strides = [1, 1]} : vector<8x64xf32> to vector<8x16xf32>
    %305 = math.tanh %304 : vector<8x16xf32>
    %306 = vector.extract_strided_slice %303 {offsets = [0, 0], sizes = [8, 16], strides = [1, 1]} : vector<8x48xf32> to vector<8x16xf32>
    %307 = vector.extract_strided_slice %303 {offsets = [0, 16], sizes = [8, 16], strides = [1, 1]} : vector<8x48xf32> to vector<8x16xf32>
    %308 = vector.extract_strided_slice %303 {offsets = [0, 32], sizes = [8, 16], strides = [1, 1]} : vector<8x48xf32> to vector<8x16xf32>
    %309 = arith.mulf %307, %268 : vector<8x16xf32>
    %310 = arith.mulf %306, %305 : vector<8x16xf32>
    %311 = arith.addf %309, %310 : vector<8x16xf32>
    %312 = math.tanh %311 : vector<8x16xf32>
    %313 = arith.mulf %308, %312 : vector<8x16xf32>
    %cst_67 = arith.constant dense<0.000000e+00> : vector<8x64xf32>
    %314 = tpu.matmul %270, %10, %cst_67 {dimension_numbers = #tpu.dot_dimension_numbers<[1], [0], [0], [1], [0, 0, 1, 1], [], []>} : vector<8x16xf32>, vector<16x64xf32>, vector<8x64xf32> -> vector<8x64xf32>
    %cst_68 = arith.constant dense<0.000000e+00> : vector<8x64xf32>
    %315 = tpu.matmul %291, %11, %cst_68 {dimension_numbers = #tpu.dot_dimension_numbers<[1], [0], [0], [1], [0, 0, 1, 1], [], []>} : vector<8x16xf32>, vector<16x64xf32>, vector<8x64xf32> -> vector<8x64xf32>
    %316 = arith.addf %314, %315 : vector<8x64xf32>
    %317 = vector.broadcast %12 : vector<1x64xf32> to vector<8x64xf32>
    %318 = arith.addf %316, %317 : vector<8x64xf32>
    %319 = vector.extract_strided_slice %318 {offsets = [0, 0], sizes = [8, 48], strides = [1, 1]} : vector<8x64xf32> to vector<8x48xf32>
    %320 = arith.negf %319 : vector<8x48xf32>
    %321 = math.exp %320 : vector<8x48xf32>
    %cst_69 = arith.constant 1.000000e+00 : f32
    %322 = vector.broadcast %cst_69 : f32 to vector<8x48xf32>
    %323 = arith.addf %322, %321 : vector<8x48xf32>
    %324 = arith.divf %322, %323 : vector<8x48xf32>
    %325 = vector.extract_strided_slice %318 {offsets = [0, 48], sizes = [8, 16], strides = [1, 1]} : vector<8x64xf32> to vector<8x16xf32>
    %326 = math.tanh %325 : vector<8x16xf32>
    %327 = vector.extract_strided_slice %324 {offsets = [0, 0], sizes = [8, 16], strides = [1, 1]} : vector<8x48xf32> to vector<8x16xf32>
    %328 = vector.extract_strided_slice %324 {offsets = [0, 16], sizes = [8, 16], strides = [1, 1]} : vector<8x48xf32> to vector<8x16xf32>
    %329 = vector.extract_strided_slice %324 {offsets = [0, 32], sizes = [8, 16], strides = [1, 1]} : vector<8x48xf32> to vector<8x16xf32>
    %330 = arith.mulf %328, %289 : vector<8x16xf32>
    %331 = arith.mulf %327, %326 : vector<8x16xf32>
    %332 = arith.addf %330, %331 : vector<8x16xf32>
    %333 = math.tanh %332 : vector<8x16xf32>
    %334 = arith.mulf %329, %333 : vector<8x16xf32>
    %c96 = arith.constant 96 : index
    %c0_70 = arith.constant 0 : index
    %335 = vector.load %arg8[%c96, %c0_70] : memref<128x1xf32, #tpu.memory_space<vmem>>, vector<16x1xf32>
    %cst_71 = arith.constant dense<0.000000e+00> : vector<8x1xf32>
    %336 = tpu.matmul %334, %335, %cst_71 {dimension_numbers = #tpu.dot_dimension_numbers<[1], [0], [0], [1], [0, 0, 1, 1], [], []>} : vector<8x16xf32>, vector<16x1xf32>, vector<8x1xf32> -> vector<8x1xf32>
    %337 = arith.addf %294, %336 : vector<8x1xf32>
    %cst_72 = arith.constant dense<0.000000e+00> : vector<8x64xf32>
    %338 = tpu.matmul %313, %10, %cst_72 {dimension_numbers = #tpu.dot_dimension_numbers<[1], [0], [0], [1], [0, 0, 1, 1], [], []>} : vector<8x16xf32>, vector<16x64xf32>, vector<8x64xf32> -> vector<8x64xf32>
    %cst_73 = arith.constant dense<0.000000e+00> : vector<8x64xf32>
    %339 = tpu.matmul %334, %11, %cst_73 {dimension_numbers = #tpu.dot_dimension_numbers<[1], [0], [0], [1], [0, 0, 1, 1], [], []>} : vector<8x16xf32>, vector<16x64xf32>, vector<8x64xf32> -> vector<8x64xf32>
    %340 = arith.addf %338, %339 : vector<8x64xf32>
    %341 = vector.broadcast %12 : vector<1x64xf32> to vector<8x64xf32>
    %342 = arith.addf %340, %341 : vector<8x64xf32>
    %343 = vector.extract_strided_slice %342 {offsets = [0, 0], sizes = [8, 48], strides = [1, 1]} : vector<8x64xf32> to vector<8x48xf32>
    %344 = arith.negf %343 : vector<8x48xf32>
    %345 = math.exp %344 : vector<8x48xf32>
    %cst_74 = arith.constant 1.000000e+00 : f32
    %346 = vector.broadcast %cst_74 : f32 to vector<8x48xf32>
    %347 = arith.addf %346, %345 : vector<8x48xf32>
    %348 = arith.divf %346, %347 : vector<8x48xf32>
    %349 = vector.extract_strided_slice %342 {offsets = [0, 48], sizes = [8, 16], strides = [1, 1]} : vector<8x64xf32> to vector<8x16xf32>
    %350 = math.tanh %349 : vector<8x16xf32>
    %351 = vector.extract_strided_slice %348 {offsets = [0, 0], sizes = [8, 16], strides = [1, 1]} : vector<8x48xf32> to vector<8x16xf32>
    %352 = vector.extract_strided_slice %348 {offsets = [0, 16], sizes = [8, 16], strides = [1, 1]} : vector<8x48xf32> to vector<8x16xf32>
    %353 = vector.extract_strided_slice %348 {offsets = [0, 32], sizes = [8, 16], strides = [1, 1]} : vector<8x48xf32> to vector<8x16xf32>
    %354 = arith.mulf %352, %332 : vector<8x16xf32>
    %355 = arith.mulf %351, %350 : vector<8x16xf32>
    %356 = arith.addf %354, %355 : vector<8x16xf32>
    %357 = math.tanh %356 : vector<8x16xf32>
    %358 = arith.mulf %353, %357 : vector<8x16xf32>
    %c112 = arith.constant 112 : index
    %c0_75 = arith.constant 0 : index
    %359 = vector.load %arg8[%c112, %c0_75] : memref<128x1xf32, #tpu.memory_space<vmem>>, vector<16x1xf32>
    %cst_76 = arith.constant dense<0.000000e+00> : vector<8x1xf32>
    %360 = tpu.matmul %358, %359, %cst_76 {dimension_numbers = #tpu.dot_dimension_numbers<[1], [0], [0], [1], [0, 0, 1, 1], [], []>} : vector<8x16xf32>, vector<16x1xf32>, vector<8x1xf32> -> vector<8x1xf32>
    %361 = arith.addf %337, %360 : vector<8x1xf32>
    %c0_77 = arith.constant 0 : index
    %c0_78 = arith.constant 0 : index
    %362 = vector.load %arg9[%c0_77, %c0_78] : memref<1x1xf32, #tpu.memory_space<vmem>>, vector<1x1xf32>
    %363 = vector.broadcast %362 : vector<1x1xf32> to vector<8x1xf32>
    %364 = arith.addf %361, %363 : vector<8x1xf32>
    %c0_79 = arith.constant 0 : index
    %c0_80 = arith.constant 0 : index
    %365 = vector.load %arg10[%c0_79, %c0_80] : memref<8x1xf32, #tpu.memory_space<vmem>>, vector<8x1xf32>
    tpu.vector_store %arg10[%c0_79, %c0_80], %364 {strides = array<i32>} : memref<8x1xf32, #tpu.memory_space<vmem>>, vector<8x1xf32>,
    %c0_81 = arith.constant 0 : index
    %c0_82 = arith.constant 0 : index
    %c0_83 = arith.constant 0 : index
    %366 = vector.load %arg11[%c0_81, %c0_82, %c0_83] : memref<2x8x16xf32, #tpu.memory_space<vmem>>, vector<1x8x16xf32>
    %367 = vector.shape_cast %366 : vector<1x8x16xf32> to vector<8x16xf32>
    %368 = vector.shape_cast %313 : vector<8x16xf32> to vector<1x8x16xf32>
    tpu.vector_store %arg11[%c0_81, %c0_82, %c0_83], %368 {strides = array<i32>} : memref<2x8x16xf32, #tpu.memory_space<vmem>>, vector<1x8x16xf32>,
    %c1 = arith.constant 1 : index
    %c0_84 = arith.constant 0 : index
    %c0_85 = arith.constant 0 : index
    %369 = vector.load %arg11[%c1, %c0_84, %c0_85] : memref<2x8x16xf32, #tpu.memory_space<vmem>>, vector<1x8x16xf32>
    %370 = vector.shape_cast %369 : vector<1x8x16xf32> to vector<8x16xf32>
    %371 = vector.shape_cast %358 : vector<8x16xf32> to vector<1x8x16xf32>
    tpu.vector_store %arg11[%c1, %c0_84, %c0_85], %371 {strides = array<i32>} : memref<2x8x16xf32, #tpu.memory_space<vmem>>, vector<1x8x16xf32>,
    %c0_86 = arith.constant 0 : index
    %c0_87 = arith.constant 0 : index
    %c0_88 = arith.constant 0 : index
    %372 = vector.load %arg12[%c0_86, %c0_87, %c0_88] : memref<2x8x16xf32, #tpu.memory_space<vmem>>, vector<1x8x16xf32>
    %373 = vector.shape_cast %372 : vector<1x8x16xf32> to vector<8x16xf32>
    %374 = vector.shape_cast %311 : vector<8x16xf32> to vector<1x8x16xf32>
    tpu.vector_store %arg12[%c0_86, %c0_87, %c0_88], %374 {strides = array<i32>} : memref<2x8x16xf32, #tpu.memory_space<vmem>>, vector<1x8x16xf32>,
    %c1_89 = arith.constant 1 : index
    %c0_90 = arith.constant 0 : index
    %c0_91 = arith.constant 0 : index
    %375 = vector.load %arg12[%c1_89, %c0_90, %c0_91] : memref<2x8x16xf32, #tpu.memory_space<vmem>>, vector<1x8x16xf32>
    %376 = vector.shape_cast %375 : vector<1x8x16xf32> to vector<8x16xf32>
    %377 = vector.shape_cast %356 : vector<8x16xf32> to vector<1x8x16xf32>
    tpu.vector_store %arg12[%c1_89, %c0_90, %c0_91], %377 {strides = array<i32>} : memref<2x8x16xf32, #tpu.memory_space<vmem>>, vector<1x8x16xf32>,
    return
  }
}

</mosaic_0001>

<bundles_post_ra>
// kernel: tpu_custom_call.1
= control target key start
LH: loop header
LB: loop body
LE: loop exit
PB: predicated region body
PF: predicated region fallthrough
CT: control target
= control target key end

     0   :  { %s4333_s0 = inlined_call_operand.vmem [shape: f32[64,8], index: 0, kind: input, shape index: {}]   ;;  %s4334_s1 = inlined_call_operand.vmem [shape: f32[64,1], index: 1, kind: input, shape index: {}]   ;;  %s4335_s2 = inlined_call_operand.vmem [shape: f32[8,64], index: 2, kind: input, shape index: {}]   ;;  %s4336_s3 = inlined_call_operand.vmem [shape: f32[16,64], index: 3, kind: input, shape index: {}]   ;;  %s4337_s4 = inlined_call_operand.vmem [shape: f32[1,64], index: 4, kind: input, shape index: {}]   ;;  %s4338_s5 = inlined_call_operand.vmem [shape: f32[16,64], index: 5, kind: input, shape index: {}]   ;;  %s4339_s6 = inlined_call_operand.vmem [shape: f32[16,64], index: 6, kind: input, shape index: {}]   ;;  %s4340_s7 = inlined_call_operand.vmem [shape: f32[1,64], index: 7, kind: input, shape index: {}]   ;;  %s4341_s8 = inlined_call_operand.vmem [shape: f32[128,1], index: 8, kind: input, shape index: {}]   ;;  %s4342_s9 = inlined_call_operand.<no memory space> [shape: f32[1,1], index: 9, kind: input, shape index: {}]   ;;  %s4343_s10 = inlined_call_operand.vmem [shape: f32[8,1], index: 10, kind: output, shape index: {0}]   ;;  %s4344_s11 = inlined_call_operand.hbm [shape: f32[2,8,16], index: 11, kind: output, shape index: {1}]   ;;  %s4345_s12 = inlined_call_operand.hbm [shape: f32[2,8,16], index: 12, kind: output, shape index: {2}]  }
   0x1   :  { %v18_v0 = vstv %s4342_s9 }
   0x2   :  { %19 = vst [vmem:[#allocation2] sm:$0x1] %v18_v0 }
   0x3   :  { %20 = vsyncpa [#allocation4], 0  ;;  %v50_v1 = vld [vmem:[%s4334_s1] sm:$0xff] }
   0x4   :  { %21 = vsyncpa [#allocation6], 0  ;;  %v3753_v2 = vmov 0   ;;  %v51_v3 = vld [vmem:[%s4334_s1 + $0x8] sm:$0xff]  ;;  %v244_v4 = vld [vmem:[%s4336_s3] sm:$0xff]  ;;  %v3754_v8 = vmov 0.0|0.0  }
   0x5   :  { %3573 = vset.pattern.permute.xlu0 %v3753_v2  ;;  %3574 = vset.pattern.permute.xlu1 %v3753_v2  ;;  %v245_v5 = vld [vmem:[%s4336_s3 + $0x8] sm:$0xff]  ;;  %v106_v6 = vld [vmem:[%s4335_s2] sm:$0xff]  ;;  %vm3755_vm0 = vmmov 0   ;;  %v3756_v9 = vmov 0.0   ;;  %vm114_vm1 = vcmask 64512   ;;  %s3757_s18 = smov 80  }
   0x6   :  { %60 = vperm.xlu0 %3573, %v50_v1   ;;  %v3848_v7 = vpack.c.bf16 %v245_v5, %v244_v4  ;;  %3227 = vmatprep.subr.mxu0 %v106_v6  ;;  %v42_v10 = vld [vmem:[%s4333_s0] sm:$0xff]  ;;  %v43_v13 = vld [vmem:[%s4333_s0 + $0x8] sm:$0xff]  ;;  %s3758_s19 = smov 16   ;;  %s3759_s20 = smov 96   ;;  %vm251_vm2 = vcmask 130048  }
   0x7   :  { %3465 = vmatprep.subr.bf16.mxu1 %v3754_v8  ;;  %3228 = vmatpush3.msra.mxu0 %v106_v6  ;;  %v3874_v18 = vld [vmem:[%s4337_s4] ss:$0 sm:$0xff]  ;;  %v249_v37 = vld [vmem:[%s4339_s6 + $0x8] sm:$0xff]  ;;  %s3760_s24 = smov 112   ;;  %s3762_s25 = smov [#allocation5]  }
   0x8   :  { %3467 = vmatpush3.bf16.msra.mxu1 %v3848_v7  ;;  %3477 = vmatprep.subr.bf16.mxu0 %v3754_v8  ;;  %v248_v36 = vld [vmem:[%s4339_s6] sm:$0xff]  ;;  %v247_v40 = vld [vmem:[%s4338_s5 + $0x8] sm:$0xff] }
   0x9   :  { %3245 = vmatprep.mubr.msk.f32.mxu1 %vm3755_vm0, %v3756_v9  ;;  %3468 = vmatprep.subr.bf16.mxu1 %v3754_v8  ;;  %v3890_v38 = vpack.c.bf16 %v249_v37, %v248_v36  ;;  %v246_v39 = vld [vmem:[%s4338_s5] sm:$0xff]  ;;  %v48_v36 = vld [vmem:[%s4333_s0 + $0x30] sm:$0xff] }
   0xa   :  { %65 = vperm.xlu0 %3573, %v51_v3   ;;  %v3902_v42 = vpack.c.bf16 %v247_v40, %v246_v39  ;;  %v3919_v49 = vld [vmem:[%s4340_s7] ss:$0 sm:$0xff] }
   0xb   :  { %3246 = vmatmul.mubr.f32.vlgmr.msra.gmra.mrb[0].mxu1 %v3756_v9 }
   0xc   :  { %3470 = vmatpush3.bf16.msra.mxu1 %v3848_v7  ;;  %3252 = vmatprep.mubr.msk.f32.mxu1 %vm3755_vm0, %v3756_v9 }
   0xd   :  { %3471 = vmatprep.subr.bf16.mxu1 %v3754_v8 }
  0x85   :  { %v61_v11 = vpop.permute.xlu0 %60 }
  0x86   :  { %v98_v12 = vmul.f32 %v61_v11, %v42_v10 }
  0x88   :  { %3229 = vmatprep.mubr.msk.f32.mxu0 %vm114_vm1, %v98_v12 }
  0x89   :  { %v66_v14 = vpop.permute.xlu0 %65 }
  0x8a   :  { %v99_v15 = vmul.f32 %v66_v14, %v43_v13  ;;  %v52_v14 = vld [vmem:[%s4334_s1 + $0x10] sm:$0xff] }
  0x8c   :  { %3230 = vmatmul.mubr.msk.f32.vlgmr.msra.gmra.mrb[0].mxu0 %vm114_vm1, %v99_v15  ;;  %v54_v15 = vld [vmem:[%s4334_s1 + $0x20] sm:$0xff] }
  0x8d   :  { %3479 = vmatpush3.bf16.msra.mxu0 %v3848_v7 }
  0x8e   :  { %3483 = vmatprep.subr.bf16.mxu0 %v3754_v8 }
  0xde   :  { %v321_v16 = vpop.f32.mrb[0].mxu1 }
  0xdf   :  { %v3247_v17 = vpop.f32.mrb[1].mxu1 }
  0xe0   :  { %v56_v17 = vld [vmem:[%s4334_s1 + $0x30] sm:$0xff] }
 0x15f   :  { %v3231_v19 = vpop.f32.mrb[0].mxu0 }
 0x160   :  { %v205_v20 = vpop.f32.mrb[1].mxu0  ;;  %v211_v43 = vadd.f32 %v3231_v19, %v3874_v18  ;;  %v53_v19 = vld [vmem:[%s4334_s1 + $0x18] sm:$0xff] }
 0x161   :  { %v206_v21 = vadd.f32 %v3874_v18, %v205_v20  ;;  %v55_v20 = vld [vmem:[%s4334_s1 + $0x28] sm:$0xff] }
 0x163   :  { %v325_v22 = vadd.f32 %v321_v16, %v206_v21  ;;  %v57_v21 = vld [vmem:[%s4334_s1 + $0x38] sm:$0xff]  ;;  %s3048_s1 = sshll.u32 %s3762_s25, 4  ;;  %s4298_s1 = int_to_ptr.vmem [resolvable:$true] %s3048_s1 }
 0x165   :  { %3575 = vtanh.f32 %v325_v22  ;;  %v3074_v24 = vmul.f32 -1.442695, %v325_v22 }
 0x167   :  { %3577 = vpow2.f32 %v3074_v24 }
 0x16f   :  { %v3576_v23 = vpop.eup %3575 }
 0x170   :  { %335 = vrot.lane.b32.xlu1 %v3576_v23, %s3757_s18 }
 0x171   :  { %v3578_v25 = vpop.eup %3577 }
 0x172   :  { %v329_v26 = vadd.f32 1.0, %v3578_v25 }
 0x174   :  { %3579 = vrcp.f32 %v329_v26  ;;  %v44_v26 = vld [vmem:[%s4333_s0 + $0x10] sm:$0xff] }
 0x17e   :  { %v3580_v27 = vpop.eup %3579 }
 0x17f   :  { %v333_v30 = vmul.f32 0.0, %v3580_v27 }
 0x1e2   :  { %v336_v28 = vpop.permute.xlu1 %335 }
 0x1e3   :  { %v338_v29 = vmul.f32 %v3580_v27, %v336_v28 }
 0x1e5   :  { %340 = vrot.lane.b32.xlu1 %v338_v29, %s3758_s19 }
 0x257   :  { %v341_v31 = vpop.permute.xlu1 %340 }
 0x258   :  { %v3879_v32 = vadd.f32 %v341_v31, %v333_v30  ;;  %v45_v30 = vld [vmem:[%s4333_s0 + $0x18] sm:$0xff]  ;;  %v46_v31 = vld [vmem:[%s4333_s0 + $0x20] sm:$0xff] }
 0x25a   :  { %3581 = vtanh.f32 %v3879_v32 }
 0x264   :  { %v3582_v33 = vpop.eup %3581 }
 0x265   :  { %346 = vrot.lane.b32.xlu0 %v3582_v33, %s3758_s19 }
 0x2d7   :  { %v347_v34 = vpop.permute.xlu0 %346 }
 0x2d8   :  { %v349_v35 = vmul.f32 %v3580_v27, %v347_v34 }
 0x2da   :  { %351 = vrot.lane.b32.xlu1 %v349_v35, %s3759_s20  ;;  %v47_v35 = vld [vmem:[%s4333_s0 + $0x28] sm:$0xff] }
 0x34c   :  { %v352_v41 = vpop.permute.xlu1 %351 }
 0x34d   :  { %3253 = vmatmul.mubr.msk.f32.vlgmr.msra.gmra.mrb[2].mxu1 %vm251_vm2, %v352_v41 }
 0x34e   :  { %3473 = vmatpush3.bf16.msra.mxu1 %v3890_v38  ;;  %3259 = vmatprep.mubr.msk.f32.mxu1 %vm3755_vm0, %v3756_v9 }
 0x34f   :  { %3474 = vmatprep.subr.bf16.mxu1 %v3754_v8 }
 0x351   :  { %3260 = vmatmul.mubr.f32.vlgmr.msra.gmra.mrb[4].mxu1 %v3756_v9 }
 0x352   :  { %3476 = vmatpush3.bf16.msra.mxu1 %v3902_v42  ;;  %3266 = vmatprep.mubr.msk.f32.mxu1 %vm3755_vm0, %v3756_v9 }
 0x353   :  { %3480 = vmatprep.subr.bf16.mxu1 %v3754_v8 }
 0x355   :  { %3267 = vmatmul.mubr.msk.f32.vlgmr.msra.gmra.mrb[6].mxu1 %vm251_vm2, %v352_v41 }
 0x356   :  { %3482 = vmatpush3.bf16.msra.mxu1 %v3890_v38  ;;  %3280 = vmatprep.mubr.msk.f32.mxu1 %vm3755_vm0, %v3756_v9 }
 0x357   :  { %3486 = vmatprep.subr.bf16.mxu1 %v3754_v8 }
 0x420   :  { %v421_v44 = vpop.f32.mrb[2].mxu1 }
 0x421   :  { %v425_v45 = vadd.f32 %v421_v44, %v211_v43  ;;  %v3254_v46 = vpop.f32.mrb[3].mxu1  ;;  %v49_v43 = vld [vmem:[%s4333_s0 + $0x38] sm:$0xff] }
 0x422   :  { %v621_v46 = vld [vmem:[%s4341_s8] sm:$0xff] }
 0x423   :  { %3583 = vtanh.f32 %v425_v45  ;;  %v3076_v56 = vmul.f32 -1.442695, %v425_v45 }
 0x424   :  { %v516_v47 = vpop.f32.mrb[4].mxu1 }
 0x425   :  { %v3261_v48 = vpop.f32.mrb[5].mxu1 }
 0x428   :  { %v586_v50 = vpop.f32.mrb[6].mxu1 }
 0x429   :  { %v587_v51 = vadd.f32 %v586_v50, %v516_v47  ;;  %v3268_v52 = vpop.f32.mrb[7].mxu1  ;;  %v622_v47 = vld [vmem:[%s4341_s8 + $0x8] sm:$0xff] }
 0x42a   :  { %v3490_v50 = vpack.c.bf16 %v622_v47, %v621_v46 }
 0x42b   :  { %v596_v53 = vadd.f32 %v3919_v49, %v587_v51 }
 0x42d   :  { %v3584_v54 = vpop.eup %3583  ;;  %3585 = vtanh.f32 %v596_v53  ;;  %v3079_v57 = vmul.f32 -1.442695, %v596_v53 }
 0x42e   :  { %435 = vrot.lane.b32.xlu0 %v3584_v54, %s3757_s18  ;;  %3587 = vpow2.f32 %v3076_v56 }
 0x42f   :  { %3589 = vpow2.f32 %v3079_v57 }
 0x437   :  { %v3586_v55 = vpop.eup %3585 }
 0x438   :  { %606 = vrot.lane.b32.xlu1 %v3586_v55, %s3757_s18  ;;  %v3588_v58 = vpop.eup %3587 }
 0x439   :  { %v429_v59 = vadd.f32 1.0, %v3588_v58  ;;  %v3590_v60 = vpop.eup %3589 }
 0x43a   :  { %v600_v61 = vadd.f32 1.0, %v3590_v60 }
 0x43b   :  { %3591 = vrcp.f32 %v429_v59 }
 0x43c   :  { %3593 = vrcp.f32 %v600_v61 }
 0x445   :  { %v3592_v62 = vpop.eup %3591 }
 0x446   :  { %v3594_v1 = vpop.eup %3593  ;;  %v433_v4 = vmul.f32 %v3592_v62, %v3879_v32 }
 0x447   :  { %v604_v10 = vmul.f32 0.0, %v3594_v1 }
 0x4a0   :  { %v436_v63 = vpop.permute.xlu0 %435 }
 0x4a1   :  { %v438_v0 = vmul.f32 %v3592_v62, %v436_v63 }
 0x4a3   :  { %440 = vrot.lane.b32.xlu0 %v438_v0, %s3758_s19 }
 0x4aa   :  { %v607_v2 = vpop.permute.xlu1 %606 }
 0x4ab   :  { %v609_v3 = vmul.f32 %v3594_v1, %v607_v2 }
 0x4ad   :  { %611 = vrot.lane.b32.xlu1 %v609_v3, %s3758_s19 }
 0x515   :  { %v441_v5 = vpop.permute.xlu0 %440 }
 0x516   :  { %v3927_v6 = vadd.f32 %v441_v5, %v433_v4 }
 0x518   :  { %3595 = vtanh.f32 %v3927_v6 }
 0x51f   :  { %v612_v11 = vpop.permute.xlu1 %611 }
 0x520   :  { %v3930_v12 = vadd.f32 %v612_v11, %v604_v10 }
 0x522   :  { %v3596_v13 = vpop.eup %3595  ;;  %3597 = vtanh.f32 %v3930_v12 }
 0x523   :  { %446 = vrot.lane.b32.xlu0 %v3596_v13, %s3758_s19 }
 0x527   :  { %70 = vperm.xlu0 %3573, %v52_v14  }
 0x52b   :  { %80 = vperm.xlu0 %3573, %v54_v15  }
 0x52c   :  { %v3598_v16 = vpop.eup %3597 }
 0x52d   :  { %617 = vrot.lane.b32.xlu1 %v3598_v16, %s3758_s19 }
 0x52f   :  { %90 = vperm.xlu0 %3573, %v56_v17  }
 0x531   :  { %75 = vperm.xlu1 %3574, %v53_v19  }
 0x535   :  { %85 = vperm.xlu1 %3574, %v55_v20  }
 0x539   :  { %95 = vperm.xlu1 %3574, %v57_v21  }
 0x595   :  { %v447_v22 = vpop.permute.xlu0 %446 }
 0x596   :  { %v449_v23 = vmul.f32 %v3592_v62, %v447_v22 }
 0x598   :  { %624 = vrot.lane.b32.xlu0 %v449_v23, %s3759_s20 }
 0x59f   :  { %v618_v24 = vpop.permute.xlu1 %617 }
 0x5a0   :  { %v620_v25 = vmul.f32 %v3594_v1, %v618_v24 }
 0x5a2   :  { %724 = vrot.lane.b32.xlu1 %v620_v25, %s3759_s20 }
 0x5a6   :  { %v71_v27 = vpop.permute.xlu0 %70 }
 0x5a7   :  { %v100_v28 = vmul.f32 %v71_v27, %v44_v26 }
 0x5a9   :  { %3232 = vmatprep.mubr.msk.f32.mxu0 %vm114_vm1, %v100_v28 }
 0x5aa   :  { %v81_v29 = vpop.permute.xlu0 %80 }
 0x5ab   :  { %v102_v34 = vmul.f32 %v81_v29, %v46_v31 }
 0x5ae   :  { %v91_v37 = vpop.permute.xlu0 %90 }
 0x5af   :  { %v104_v41 = vmul.f32 %v91_v37, %v48_v36 }
 0x5b0   :  { %v76_v32 = vpop.permute.xlu1 %75 }
 0x5b1   :  { %v101_v33 = vmul.f32 %v76_v32, %v45_v30 }
 0x5b3   :  { %3233 = vmatmul.mubr.msk.f32.gmra.mrb[2].mxu0 %vm114_vm1, %v101_v33 }
 0x5b4   :  { %3235 = vmatprep.mubr.msk.f32.mxu0 %vm114_vm1, %v102_v34  ;;  %v86_v39 = vpop.permute.xlu1 %85  ;;  %v894_v34 = vld [vmem:[%s4341_s8 + $0x18] sm:$0xff] }
 0x5b5   :  { %v103_v40 = vmul.f32 %v86_v39, %v47_v35 }
 0x5b7   :  { %3236 = vmatmul.mubr.msk.f32.gmra.mrb[4].mxu0 %vm114_vm1, %v103_v40 }
 0x5b8   :  { %3238 = vmatprep.mubr.msk.f32.mxu0 %vm114_vm1, %v104_v41  ;;  %v96_v44 = vpop.permute.xlu1 %95 }
 0x5b9   :  { %v105_v45 = vmul.f32 %v96_v44, %v49_v43 }
 0x5bb   :  { %3239 = vmatmul.mubr.msk.f32.gmra.mrb[6].mxu0 %vm114_vm1, %v105_v45 }
 0x5bc   :  { %3273 = vmatprep.mubr.msk.f32.mxu0 %vm3755_vm0, %v3756_v9 }
 0x60a   :  { %v625_v48 = vpop.permute.xlu0 %624 }
 0x60b   :  { %3274 = vmatmul.mubr.msk.f32.vlgmr.msra.gmra.mrb[8].mxu0 %vm251_vm2, %v625_v48 }
 0x60c   :  { %3485 = vmatpush3.bf16.msra.mxu0 %v3902_v42  ;;  %3287 = vmatprep.mubr.msk.f32.mxu0 %vm3755_vm0, %v3756_v9 }
 0x60d   :  { %3489 = vmatprep.subr.bf16.mxu0 %v3754_v8 }
 0x60f   :  { %3288 = vmatmul.mubr.msk.f32.vlgmr.msra.gmra.mrb[10].mxu0 %vm251_vm2, %v625_v48 }
 0x610   :  { %3491 = vmatpush3.bf16.msra.mxu0 %v3490_v50  ;;  %3301 = vmatprep.mubr.msk.f32.mxu0 %vm3755_vm0, %v3756_v9 }
 0x611   :  { %3495 = vmatprep.subr.bf16.mxu0 %v3754_v8 }
 0x614   :  { %v725_v51 = vpop.permute.xlu1 %724 }
 0x615   :  { %3281 = vmatmul.mubr.msk.f32.vlgmr.msra.gmra.mrb[8].mxu1 %vm251_vm2, %v725_v51  ;;  %3302 = vmatmul.mubr.msk.f32.vlgmr.msra.gmra.mrb[12].mxu0 %vm251_vm2, %v725_v51 }
 0x616   :  { %3497 = vmatpush3.bf16.msra.mxu0 %v3890_v38  ;;  %3294 = vmatprep.mubr.msk.f32.mxu1 %vm3755_vm0, %v3756_v9 }
 0x617   :  { %3315 = vmatprep.mubr.msk.f32.mxu0 %vm3755_vm0, %v3756_v9  ;;  %3501 = vmatprep.subr.bf16.mxu0 %v3754_v8 }
 0x686   :  { %v4004_v52 = vpop.f32.mrb[2].mxu0 }
 0x687   :  { %v215_v53 = vpop.f32.mrb[3].mxu0  ;;  %v221_v48 = vadd.f32 %v4004_v52, %v3874_v18 }
 0x688   :  { %v216_v58 = vadd.f32 %v3874_v18, %v215_v53 }
 0x68a   :  { %v4006_v54 = vpop.f32.mrb[4].mxu0 }
 0x68b   :  { %v4008_v55 = vpop.f32.mrb[5].mxu0 }
 0x68e   :  { %v4010_v56 = vpop.f32.mrb[6].mxu0 }
 0x68f   :  { %v4012_v57 = vpop.f32.mrb[7].mxu0 }
 0x6de   :  { %v694_v59 = vpop.f32.mrb[8].mxu0 }
 0x6df   :  { %v698_v60 = vadd.f32 %v694_v59, %v216_v58  ;;  %v3275_v61 = vpop.f32.mrb[9].mxu0 }
 0x6e1   :  { %3599 = vtanh.f32 %v698_v60  ;;  %v3081_v13 = vmul.f32 -1.442695, %v698_v60 }
 0x6e2   :  { %v864_v62 = vpop.f32.mrb[10].mxu0 }
 0x6e3   :  { %v3289_v63 = vpop.f32.mrb[11].mxu0 }
 0x6e8   :  { %v794_v0 = vpop.f32.mrb[8].mxu1  ;;  %v4015_v1 = vpop.f32.mrb[12].mxu0 }
 0x6e9   :  { %v865_v2 = vadd.f32 %v864_v62, %v794_v0  ;;  %v3282_v3 = vpop.f32.mrb[9].mxu1  ;;  %v3303_v4 = vpop.f32.mrb[13].mxu0 }
 0x6eb   :  { %v3600_v5 = vpop.eup %3599  ;;  %v868_v10 = vadd.f32 %v3919_v49, %v865_v2 }
 0x6ec   :  { %708 = vrot.lane.b32.xlu1 %v3600_v5, %s3757_s18 }
 0x6ed   :  { %3601 = vtanh.f32 %v868_v10  ;;  %v3084_v14 = vmul.f32 -1.442695, %v868_v10 }
 0x6ee   :  { %3603 = vpow2.f32 %v3081_v13 }
 0x6ef   :  { %3605 = vpow2.f32 %v3084_v14 }
 0x6f7   :  { %v3602_v11 = vpop.eup %3601 }
 0x6f8   :  { %878 = vrot.lane.b32.xlu0 %v3602_v11, %s3757_s18  ;;  %v3604_v15 = vpop.eup %3603 }
 0x6f9   :  { %v702_v16 = vadd.f32 1.0, %v3604_v15  ;;  %v3606_v17 = vpop.eup %3605 }
 0x6fa   :  { %v872_v19 = vadd.f32 1.0, %v3606_v17 }
 0x6fb   :  { %3607 = vrcp.f32 %v702_v16 }
 0x6fc   :  { %3609 = vrcp.f32 %v872_v19 }
 0x705   :  { %v3608_v20 = vpop.eup %3607 }
 0x706   :  { %v3610_v23 = vpop.eup %3609  ;;  %v706_v26 = vmul.f32 %v3608_v20, %v3927_v6  ;;  %v893_v6 = vld [vmem:[%s4341_s8 + $0x10] sm:$0xff] }
 0x707   :  { %v876_v29 = vmul.f32 %v3610_v23, %v3930_v12  ;;  %v3487_v12 = vpack.c.bf16 %v894_v34, %v893_v6  ;;  %v226_v6 = vadd.f32 %v3874_v18, %v4008_v55 }
 0x709   :  { %3488 = vmatpush3.bf16.msra.mxu1 %v3487_v12 }
 0x70a   :  { %3492 = vmatprep.subr.bf16.mxu1 %v3754_v8 }
 0x75e   :  { %v709_v21 = vpop.permute.xlu1 %708 }
 0x75f   :  { %v711_v22 = vmul.f32 %v3608_v20, %v709_v21 }
 0x761   :  { %713 = vrot.lane.b32.xlu1 %v711_v22, %s3758_s19 }
 0x76a   :  { %v879_v24 = vpop.permute.xlu0 %878 }
 0x76b   :  { %v881_v25 = vmul.f32 %v3610_v23, %v879_v24 }
 0x76d   :  { %883 = vrot.lane.b32.xlu0 %v881_v25, %s3758_s19  ;;  %v1305_v25 = vld [vmem:[%s4341_s8 + $0x20] sm:$0xff] }
 0x7d3   :  { %v714_v27 = vpop.permute.xlu1 %713 }
 0x7d4   :  { %v4023_v28 = vadd.f32 %v714_v27, %v706_v26  ;;  %v1306_v26 = vld [vmem:[%s4341_s8 + $0x28] sm:$0xff] }
 0x7d5   :  { %v3502_v27 = vpack.c.bf16 %v1306_v26, %v1305_v25 }
 0x7d6   :  { %3611 = vtanh.f32 %v4023_v28 }
 0x7df   :  { %v884_v30 = vpop.permute.xlu0 %883 }
 0x7e0   :  { %v3612_v31 = vpop.eup %3611  ;;  %v4027_v32 = vadd.f32 %v884_v30, %v876_v29 }
 0x7e1   :  { %719 = vrot.lane.b32.xlu1 %v3612_v31, %s3758_s19 }
 0x7e2   :  { %3613 = vtanh.f32 %v4027_v32 }
 0x7ec   :  { %v3614_v33 = vpop.eup %3613 }
 0x7ed   :  { %889 = vrot.lane.b32.xlu0 %v3614_v33, %s3758_s19 }
 0x853   :  { %v720_v35 = vpop.permute.xlu1 %719 }
 0x854   :  { %v722_v36 = vmul.f32 %v3608_v20, %v720_v35 }
 0x856   :  { %1041 = vrot.lane.b32.xlu1 %v722_v36, %s3759_s20 }
 0x85f   :  { %v890_v37 = vpop.permute.xlu0 %889 }
 0x860   :  { %v892_v39 = vmul.f32 %v3610_v23, %v890_v37 }
 0x862   :  { %896 = vrot.lane.b32.xlu0 %v892_v39, %s3759_s20 }
 0x8c8   :  { %v1042_v41 = vpop.permute.xlu1 %1041 }
 0x8d4   :  { %v897_v40 = vpop.permute.xlu0 %896 }
 0x8d5   :  { %3295 = vmatmul.mubr.msk.f32.vlgmr.msra.gmra.mrb[10].mxu1 %vm251_vm2, %v897_v40  ;;  %3316 = vmatmul.mubr.msk.f32.vlgmr.msra.gmra.mrb[14].mxu0 %vm251_vm2, %v897_v40 }
 0x8d6   :  { %3494 = vmatpush3.bf16.msra.mxu1 %v3848_v7  ;;  %3308 = vmatprep.mubr.msk.f32.mxu1 %vm3755_vm0, %v3756_v9 }
 0x8d7   :  { %3498 = vmatprep.subr.bf16.mxu1 %v3754_v8  ;;  %3329 = vmatprep.mubr.msk.f32.mxu0 %vm3755_vm0, %v3756_v9 }
 0x8d8   :  { %3503 = vmatpush3.bf16.msra.mxu0 %v3502_v27 }
 0x8d9   :  { %3309 = vmatmul.mubr.msk.f32.vlgmr.msra.gmra.mrb[12].mxu1 %vm251_vm2, %v1042_v41  ;;  %3507 = vmatprep.subr.bf16.mxu0 %v3754_v8 }
 0x8da   :  { %3500 = vmatpush3.bf16.msra.mxu1 %v3902_v42  ;;  %3322 = vmatprep.mubr.msk.f32.mxu1 %vm3755_vm0, %v3756_v9 }
 0x8db   :  { %3504 = vmatprep.subr.bf16.mxu1 %v3754_v8 }
 0x8dd   :  { %3323 = vmatmul.mubr.msk.f32.vlgmr.msra.gmra.mrb[14].mxu1 %vm251_vm2, %v1042_v41 }
 0x8de   :  { %3506 = vmatpush3.bf16.msra.mxu1 %v3848_v7  ;;  %3336 = vmatprep.mubr.msk.f32.mxu1 %vm3755_vm0, %v3756_v9 }
 0x8df   :  { %3510 = vmatprep.subr.bf16.mxu1 %v3754_v8 }
 0x9a8   :  { %v966_v43 = vpop.f32.mrb[10].mxu1  ;;  %v1206_v44 = vpop.f32.mrb[14].mxu0 }
 0x9a9   :  { %v4060_v45 = vadd.f32 %v4015_v1, %v966_v43  ;;  %v3296_v46 = vpop.f32.mrb[11].mxu1  ;;  %v3317_v47 = vpop.f32.mrb[15].mxu0 }
 0x9ac   :  { %v1111_v50 = vpop.f32.mrb[12].mxu1 }
 0x9ad   :  { %v1115_v51 = vadd.f32 %v1111_v50, %v221_v48  ;;  %v3310_v53 = vpop.f32.mrb[13].mxu1 }
 0x9af   :  { %3615 = vtanh.f32 %v1115_v51  ;;  %v3088_v0 = vmul.f32 -1.442695, %v1115_v51 }
 0x9b0   :  { %v1276_v58 = vpop.f32.mrb[14].mxu1 }
 0x9b1   :  { %v1277_v59 = vadd.f32 %v1276_v58, %v1206_v44  ;;  %v3324_v60 = vpop.f32.mrb[15].mxu1 }
 0x9b3   :  { %v1280_v61 = vadd.f32 %v3919_v49, %v1277_v59 }
 0x9b5   :  { %3617 = vtanh.f32 %v1280_v61  ;;  %v3091_v1 = vmul.f32 -1.442695, %v1280_v61 }
 0x9b6   :  { %3619 = vpow2.f32 %v3088_v0 }
 0x9b7   :  { %3621 = vpow2.f32 %v3091_v1 }
 0x9b9   :  { %v3616_v62 = vpop.eup %3615 }
 0x9ba   :  { %1125 = vrot.lane.b32.xlu0 %v3616_v62, %s3757_s18 }
 0x9bf   :  { %v3618_v63 = vpop.eup %3617 }
 0x9c0   :  { %1290 = vrot.lane.b32.xlu1 %v3618_v63, %s3757_s18  ;;  %v3620_v52 = vpop.eup %3619 }
 0x9c1   :  { %v1119_v2 = vadd.f32 1.0, %v3620_v52  ;;  %v3622_v3 = vpop.eup %3621 }
 0x9c2   :  { %v1284_v4 = vadd.f32 1.0, %v3622_v3 }
 0x9c3   :  { %3623 = vrcp.f32 %v1119_v2 }
 0x9c4   :  { %3625 = vrcp.f32 %v1284_v4 }
 0x9cd   :  { %v3624_v5 = vpop.eup %3623 }
 0x9ce   :  { %v3626_v13 = vpop.eup %3625  ;;  %v1123_v16 = vmul.f32 %v3624_v5, %v4023_v28 }
 0x9cf   :  { %v1288_v20 = vmul.f32 %v3626_v13, %v4027_v32 }
 0xa2c   :  { %v1126_v10 = vpop.permute.xlu0 %1125 }
 0xa2d   :  { %v1128_v11 = vmul.f32 %v3624_v5, %v1126_v10 }
 0xa2f   :  { %1130 = vrot.lane.b32.xlu0 %v1128_v11, %s3758_s19 }
 0xa32   :  { %v1291_v14 = vpop.permute.xlu1 %1290 }
 0xa33   :  { %v1293_v15 = vmul.f32 %v3626_v13, %v1291_v14  ;;  %v1648_v14 = vld [vmem:[%s4341_s8 + $0x30] sm:$0xff] }
 0xa35   :  { %1295 = vrot.lane.b32.xlu1 %v1293_v15, %s3758_s19  ;;  %v1649_v15 = vld [vmem:[%s4341_s8 + $0x38] sm:$0xff] }
 0xaa1   :  { %v1131_v17 = vpop.permute.xlu0 %1130 }
 0xaa2   :  { %v4070_v19 = vadd.f32 %v1131_v17, %v1123_v16  ;;  %v3514_v16 = vpack.c.bf16 %v1649_v15, %v1648_v14 }
 0xaa4   :  { %3627 = vtanh.f32 %v4070_v19 }
 0xaa7   :  { %v1296_v21 = vpop.permute.xlu1 %1295 }
 0xaa8   :  { %v4074_v22 = vadd.f32 %v1296_v21, %v1288_v20 }
 0xaaa   :  { %3629 = vtanh.f32 %v4074_v22 }
 0xaae   :  { %v3628_v23 = vpop.eup %3627 }
 0xaaf   :  { %1136 = vrot.lane.b32.xlu0 %v3628_v23, %s3758_s19 }
 0xab4   :  { %v3630_v24 = vpop.eup %3629 }
 0xab5   :  { %1301 = vrot.lane.b32.xlu1 %v3630_v24, %s3758_s19  ;;  %v231_v24 = vadd.f32 %v4006_v54, %v3874_v18 }
 0xb21   :  { %v1137_v28 = vpop.permute.xlu0 %1136 }
 0xb22   :  { %v1139_v29 = vmul.f32 %v3624_v5, %v1137_v28 }
 0xb24   :  { %1384 = vrot.lane.b32.xlu1 %v1139_v29, %s3759_s20 }
 0xb27   :  { %v1302_v30 = vpop.permute.xlu1 %1301 }
 0xb28   :  { %v1304_v31 = vmul.f32 %v3626_v13, %v1302_v30 }
 0xb2a   :  { %1308 = vrot.lane.b32.xlu0 %v1304_v31, %s3759_s20 }
 0xb96   :  { %v1385_v32 = vpop.permute.xlu1 %1384 }
 0xb97   :  { %3337 = vmatmul.mubr.msk.f32.vlgmr.msra.gmra.mrb[16].mxu1 %vm251_vm2, %v1385_v32 }
 0xb98   :  { %3512 = vmatpush3.bf16.msra.mxu1 %v3902_v42  ;;  %3350 = vmatprep.mubr.msk.f32.mxu1 %vm3755_vm0, %v3756_v9 }
 0xb99   :  { %3516 = vmatprep.subr.bf16.mxu1 %v3754_v8 }
 0xb9b   :  { %3351 = vmatmul.mubr.msk.f32.vlgmr.msra.gmra.mrb[18].mxu1 %vm251_vm2, %v1385_v32 }
 0xb9c   :  { %v1309_v33 = vpop.permute.xlu0 %1308  ;;  %3518 = vmatpush3.bf16.msra.mxu1 %v3848_v7  ;;  %3364 = vmatprep.mubr.msk.f32.mxu1 %vm3755_vm0, %v3756_v9 }
 0xb9d   :  { %3330 = vmatmul.mubr.msk.f32.vlgmr.msra.gmra.mrb[16].mxu0 %vm251_vm2, %v1309_v33  ;;  %3522 = vmatprep.subr.bf16.mxu1 %v3754_v8 }
 0xb9e   :  { %3509 = vmatpush3.bf16.msra.mxu0 %v3890_v38  ;;  %3343 = vmatprep.mubr.msk.f32.mxu0 %vm3755_vm0, %v3756_v9 }
 0xb9f   :  { %3513 = vmatprep.subr.bf16.mxu0 %v3754_v8 }
 0xba1   :  { %3344 = vmatmul.mubr.msk.f32.vlgmr.msra.gmra.mrb[18].mxu0 %vm251_vm2, %v1309_v33 }
 0xba2   :  { %3357 = vmatprep.mubr.msk.f32.mxu0 %vm3755_vm0, %v3756_v9  ;;  %3515 = vmatpush3.bf16.msra.mxu0 %v3514_v16 }
 0xba3   :  { %3519 = vmatprep.subr.bf16.mxu0 %v3754_v8 }
 0xc6a   :  { %v1454_v34 = vpop.f32.mrb[16].mxu1 }
 0xc6b   :  { %v1458_v12 = vadd.f32 %v1454_v34, %v226_v6  ;;  %v3338_v35 = vpop.f32.mrb[17].mxu1 }
 0xc6d   :  { %3631 = vtanh.f32 %v1458_v12  ;;  %v3094_v50 = vmul.f32 -1.442695, %v1458_v12 }
 0xc6e   :  { %v1619_v36 = vpop.f32.mrb[18].mxu1 }
 0xc6f   :  { %v3352_v37 = vpop.f32.mrb[19].mxu1 }
 0xc70   :  { %v1378_v39 = vpop.f32.mrb[16].mxu0 }
 0xc71   :  { %v4109_v40 = vadd.f32 %v1378_v39, %v4060_v45  ;;  %v3331_v41 = vpop.f32.mrb[17].mxu0 }
 0xc74   :  { %v1549_v43 = vpop.f32.mrb[18].mxu0 }
 0xc75   :  { %v1620_v44 = vadd.f32 %v1619_v36, %v1549_v43  ;;  %v3345_v46 = vpop.f32.mrb[19].mxu0 }
 0xc77   :  { %v3632_v47 = vpop.eup %3631  ;;  %v1623_v48 = vadd.f32 %v3919_v49, %v1620_v44 }
 0xc78   :  { %1468 = vrot.lane.b32.xlu0 %v3632_v47, %s3757_s18 }
 0xc79   :  { %3633 = vtanh.f32 %v1623_v48  ;;  %v3097_v51 = vmul.f32 -1.442695, %v1623_v48 }
 0xc7a   :  { %3635 = vpow2.f32 %v3094_v50 }
 0xc7b   :  { %3637 = vpow2.f32 %v3097_v51 }
 0xc83   :  { %v3634_v55 = vpop.eup %3633 }
 0xc84   :  { %1633 = vrot.lane.b32.xlu1 %v3634_v55, %s3757_s18  ;;  %v3636_v53 = vpop.eup %3635 }
 0xc85   :  { %v1462_v45 = vadd.f32 1.0, %v3636_v53  ;;  %v3638_v58 = vpop.eup %3637 }
 0xc86   :  { %v1627_v59 = vadd.f32 1.0, %v3638_v58 }
 0xc87   :  { %3639 = vrcp.f32 %v1462_v45 }
 0xc88   :  { %3641 = vrcp.f32 %v1627_v59 }
 0xc91   :  { %v3640_v60 = vpop.eup %3639 }
 0xc92   :  { %v3642_v63 = vpop.eup %3641  ;;  %v1466_v52 = vmul.f32 %v3640_v60, %v4070_v19 }
 0xc93   :  { %v1631_v4 = vmul.f32 %v3642_v63, %v4074_v22 }
 0xcea   :  { %v1469_v61 = vpop.permute.xlu0 %1468 }
 0xceb   :  { %v1471_v62 = vmul.f32 %v3640_v60, %v1469_v61 }
 0xced   :  { %1473 = vrot.lane.b32.xlu0 %v1471_v62, %s3758_s19 }
 0xcf6   :  { %v1634_v0 = vpop.permute.xlu1 %1633 }
 0xcf7   :  { %v1636_v1 = vmul.f32 %v3642_v63, %v1634_v0  ;;  %v1992_v0 = vld [vmem:[%s4341_s8 + $0x48] sm:$0xff] }
 0xcf9   :  { %1638 = vrot.lane.b32.xlu1 %v1636_v1, %s3758_s19 }
 0xd5f   :  { %v1474_v2 = vpop.permute.xlu0 %1473 }
 0xd60   :  { %v4117_v3 = vadd.f32 %v1474_v2, %v1466_v52 }
 0xd62   :  { %3643 = vtanh.f32 %v4117_v3 }
 0xd6b   :  { %v1639_v5 = vpop.permute.xlu1 %1638 }
 0xd6c   :  { %v3644_v10 = vpop.eup %3643  ;;  %v4121_v11 = vadd.f32 %v1639_v5, %v1631_v4 }
 0xd6d   :  { %1479 = vrot.lane.b32.xlu0 %v3644_v10, %s3758_s19 }
 0xd6e   :  { %3645 = vtanh.f32 %v4121_v11 }
 0xd78   :  { %v3646_v13 = vpop.eup %3645 }
 0xd79   :  { %1644 = vrot.lane.b32.xlu1 %v3646_v13, %s3758_s19 }
 0xddf   :  { %v1480_v17 = vpop.permute.xlu0 %1479 }
 0xde0   :  { %v1482_v19 = vmul.f32 %v3640_v60, %v1480_v17 }
 0xde2   :  { %1727 = vrot.lane.b32.xlu1 %v1482_v19, %s3759_s20 }
 0xdeb   :  { %v1645_v20 = vpop.permute.xlu1 %1644 }
 0xdec   :  { %v1647_v21 = vmul.f32 %v3642_v63, %v1645_v20  ;;  %v1991_v63 = vld [vmem:[%s4341_s8 + $0x40] sm:$0xff] }
 0xded   :  { %v3526_v1 = vpack.c.bf16 %v1992_v0, %v1991_v63 }
 0xdee   :  { %1651 = vrot.lane.b32.xlu0 %v1647_v21, %s3759_s20 }
 0xe54   :  { %v1728_v22 = vpop.permute.xlu1 %1727 }
 0xe55   :  { %3365 = vmatmul.mubr.msk.f32.vlgmr.msra.gmra.mrb[20].mxu1 %vm251_vm2, %v1728_v22 }
 0xe56   :  { %3524 = vmatpush3.bf16.msra.mxu1 %v3902_v42  ;;  %3378 = vmatprep.mubr.msk.f32.mxu1 %vm3755_vm0, %v3756_v9 }
 0xe57   :  { %3528 = vmatprep.subr.bf16.mxu1 %v3754_v8 }
 0xe59   :  { %3379 = vmatmul.mubr.msk.f32.vlgmr.msra.gmra.mrb[22].mxu1 %vm251_vm2, %v1728_v22 }
 0xe5a   :  { %3530 = vmatpush3.bf16.msra.mxu1 %v3848_v7  ;;  %3392 = vmatprep.mubr.msk.f32.mxu1 %vm3755_vm0, %v3756_v9 }
 0xe5b   :  { %3534 = vmatprep.subr.bf16.mxu1 %v3754_v8 }
 0xe60   :  { %v1652_v23 = vpop.permute.xlu0 %1651 }
 0xe61   :  { %3358 = vmatmul.mubr.msk.f32.vlgmr.msra.gmra.mrb[20].mxu0 %vm251_vm2, %v1652_v23 }
 0xe62   :  { %3521 = vmatpush3.bf16.msra.mxu0 %v3890_v38  ;;  %3371 = vmatprep.mubr.msk.f32.mxu0 %vm3755_vm0, %v3756_v9 }
 0xe63   :  { %3525 = vmatprep.subr.bf16.mxu0 %v3754_v8 }
 0xe65   :  { %3372 = vmatmul.mubr.msk.f32.vlgmr.msra.gmra.mrb[22].mxu0 %vm251_vm2, %v1652_v23 }
 0xe66   :  { %3385 = vmatprep.mubr.msk.f32.mxu0 %vm3755_vm0, %v3756_v9  ;;  %3527 = vmatpush3.bf16.msra.mxu0 %v3526_v1 }
 0xe67   :  { %3531 = vmatprep.subr.bf16.mxu0 %v3754_v8 }
 0xf28   :  { %v1797_v25 = vpop.f32.mrb[20].mxu1 }
 0xf29   :  { %v1801_v26 = vadd.f32 %v1797_v25, %v231_v24  ;;  %v3366_v27 = vpop.f32.mrb[21].mxu1 }
 0xf2b   :  { %3647 = vtanh.f32 %v1801_v26  ;;  %v3100_v36 = vmul.f32 -1.442695, %v1801_v26 }
 0xf2c   :  { %v1962_v28 = vpop.f32.mrb[22].mxu1 }
 0xf2d   :  { %v3380_v29 = vpop.f32.mrb[23].mxu1 }
 0xf34   :  { %v1721_v30 = vpop.f32.mrb[20].mxu0 }
 0xf35   :  { %v3648_v31 = vpop.eup %3647  ;;  %v4156_v32 = vadd.f32 %v1721_v30, %v4109_v40  ;;  %v3359_v33 = vpop.f32.mrb[21].mxu0 }
 0xf36   :  { %1811 = vrot.lane.b32.xlu0 %v3648_v31, %s3757_s18 }
 0xf38   :  { %v1892_v6 = vpop.f32.mrb[22].mxu0 }
 0xf39   :  { %v1963_v34 = vadd.f32 %v1962_v28, %v1892_v6  ;;  %v3373_v12 = vpop.f32.mrb[23].mxu0 }
 0xf3b   :  { %v1966_v35 = vadd.f32 %v3919_v49, %v1963_v34 }
 0xf3d   :  { %3649 = vtanh.f32 %v1966_v35  ;;  %v3103_v41 = vmul.f32 -1.442695, %v1966_v35 }
 0xf3e   :  { %3651 = vpow2.f32 %v3100_v36 }
 0xf47   :  { %v3650_v54 = vpop.eup %3649 }
 0xf48   :  { %1976 = vrot.lane.b32.xlu1 %v3650_v54, %s3757_s18  ;;  %v3652_v37 = vpop.eup %3651 }
 0xf49   :  { %v1805_v39 = vadd.f32 1.0, %v3652_v37 }
 0xf4b   :  { %3653 = vrcp.f32 %v1805_v39 }
 0xf4c   :  { %3655 = vpow2.f32 %v3103_v41 }
 0xf55   :  { %v3654_v40 = vpop.eup %3653 }
 0xf56   :  { %v3656_v44 = vpop.eup %3655  ;;  %v1809_v51 = vmul.f32 %v3654_v40, %v4117_v3 }
 0xf57   :  { %v1970_v47 = vadd.f32 1.0, %v3656_v44  ;;  %v2334_v44 = vld [vmem:[%s4341_s8 + $0x50] sm:$0xff] }
 0xf59   :  { %3657 = vrcp.f32 %v1970_v47 }
 0xf63   :  { %v3658_v48 = vpop.eup %3657 }
 0xf64   :  { %v1974_v59 = vmul.f32 %v3658_v48, %v4121_v11 }
 0xfa8   :  { %v1812_v43 = vpop.permute.xlu0 %1811 }
 0xfa9   :  { %v1814_v46 = vmul.f32 %v3654_v40, %v1812_v43 }
 0xfab   :  { %1816 = vrot.lane.b32.xlu0 %v1814_v46, %s3758_s19  ;;  %v2335_v46 = vld [vmem:[%s4341_s8 + $0x58] sm:$0xff] }
 0xfac   :  { %v3538_v47 = vpack.c.bf16 %v2335_v46, %v2334_v44 }
 0xfba   :  { %v1977_v55 = vpop.permute.xlu1 %1976 }
 0xfbb   :  { %v1979_v50 = vmul.f32 %v3658_v48, %v1977_v55 }
 0xfbd   :  { %1981 = vrot.lane.b32.xlu1 %v1979_v50, %s3758_s19 }
0x101d   :  { %v1817_v53 = vpop.permute.xlu0 %1816 }
0x101e   :  { %v4164_v45 = vadd.f32 %v1817_v53, %v1809_v51 }
0x1020   :  { %3659 = vtanh.f32 %v4164_v45 }
0x102a   :  { %v3660_v58 = vpop.eup %3659 }
0x102b   :  { %1822 = vrot.lane.b32.xlu0 %v3660_v58, %s3758_s19  ;;  %v3703_v58 = vld [vmem:[%s4337_s4] ss:$0 sm:$0xff] }
0x102f   :  { %v1982_v60 = vpop.permute.xlu1 %1981 }
0x1030   :  { %v4169_v61 = vadd.f32 %v1982_v60, %v1974_v59  ;;  %v241_v59 = vadd.f32 %v3703_v58, %v4010_v56 }
0x1032   :  { %3661 = vtanh.f32 %v4169_v61 }
0x103c   :  { %v3662_v62 = vpop.eup %3661 }
0x103d   :  { %1987 = vrot.lane.b32.xlu1 %v3662_v62, %s3758_s19 }
0x109d   :  { %v1823_v52 = vpop.permute.xlu0 %1822 }
0x109e   :  { %v1825_v2 = vmul.f32 %v3654_v40, %v1823_v52 }
0x10a0   :  { %2070 = vrot.lane.b32.xlu1 %v1825_v2, %s3759_s20 }
0x10af   :  { %v1988_v3 = vpop.permute.xlu1 %1987 }
0x10b0   :  { %v1990_v4 = vmul.f32 %v3658_v48, %v1988_v3 }
0x10b2   :  { %1994 = vrot.lane.b32.xlu0 %v1990_v4, %s3759_s20 }
0x1112   :  { %v2071_v5 = vpop.permute.xlu1 %2070 }
0x1113   :  { %3393 = vmatmul.mubr.msk.f32.vlgmr.msra.gmra.mrb[24].mxu1 %vm251_vm2, %v2071_v5 }
0x1114   :  { %3536 = vmatpush3.bf16.msra.mxu1 %v3902_v42  ;;  %3406 = vmatprep.mubr.msk.f32.mxu1 %vm3755_vm0, %v3756_v9 }
0x1115   :  { %3540 = vmatprep.subr.bf16.mxu1 %v3754_v8 }
0x1117   :  { %3407 = vmatmul.mubr.msk.f32.vlgmr.msra.gmra.mrb[26].mxu1 %vm251_vm2, %v2071_v5 }
0x1118   :  { %3542 = vmatpush3.bf16.msra.mxu1 %v3848_v7  ;;  %3420 = vmatprep.mubr.msk.f32.mxu1 %vm3755_vm0, %v3756_v9  ;;  %v236_v7 = vadd.f32 %v3874_v18, %v4012_v57 }
0x1119   :  { %3546 = vmatprep.subr.bf16.mxu1 %v3754_v8 }
0x1124   :  { %v1995_v10 = vpop.permute.xlu0 %1994 }
0x1125   :  { %3386 = vmatmul.mubr.msk.f32.vlgmr.msra.gmra.mrb[24].mxu0 %vm251_vm2, %v1995_v10 }
0x1126   :  { %3533 = vmatpush3.bf16.msra.mxu0 %v3890_v38  ;;  %3399 = vmatprep.mubr.msk.f32.mxu0 %vm3755_vm0, %v3756_v9 }
0x1127   :  { %3537 = vmatprep.subr.bf16.mxu0 %v3754_v8 }
0x1129   :  { %3400 = vmatmul.mubr.msk.f32.vlgmr.msra.gmra.mrb[26].mxu0 %vm251_vm2, %v1995_v10 }
0x112a   :  { %3413 = vmatprep.mubr.msk.f32.mxu0 %vm3755_vm0, %v3756_v9  ;;  %3539 = vmatpush3.bf16.msra.mxu0 %v3538_v47 }
0x112b   :  { %3543 = vmatprep.subr.bf16.mxu0 %v3754_v8 }
0x11e6   :  { %v2140_v11 = vpop.f32.mrb[24].mxu1 }
0x11e7   :  { %v2144_v13 = vadd.f32 %v2140_v11, %v236_v7  ;;  %v3394_v14 = vpop.f32.mrb[25].mxu1 }
0x11e9   :  { %3663 = vtanh.f32 %v2144_v13  ;;  %v3106_v57 = vmul.f32 -1.442695, %v2144_v13 }
0x11ea   :  { %v2305_v15 = vpop.f32.mrb[26].mxu1 }
0x11eb   :  { %v3408_v16 = vpop.f32.mrb[27].mxu1 }
0x11f3   :  { %v3664_v17 = vpop.eup %3663 }
0x11f4   :  { %2154 = vrot.lane.b32.xlu0 %v3664_v17, %s3757_s18 }
0x11f8   :  { %v2064_v19 = vpop.f32.mrb[24].mxu0 }
0x11f9   :  { %v4204_v20 = vadd.f32 %v2064_v19, %v4156_v32  ;;  %v3387_v21 = vpop.f32.mrb[25].mxu0 }
0x11fc   :  { %v2235_v22 = vpop.f32.mrb[26].mxu0 }
0x11fd   :  { %v2306_v23 = vadd.f32 %v2305_v15, %v2235_v22  ;;  %v3401_v24 = vpop.f32.mrb[27].mxu0 }
0x11ff   :  { %v2309_v25 = vadd.f32 %v3919_v49, %v2306_v23 }
0x1201   :  { %3665 = vtanh.f32 %v2309_v25  ;;  %v3109_v28 = vmul.f32 -1.442695, %v2309_v25 }
0x1202   :  { %3667 = vpow2.f32 %v3106_v57 }
0x120b   :  { %v3666_v18 = vpop.eup %3665 }
0x120c   :  { %2319 = vrot.lane.b32.xlu1 %v3666_v18, %s3757_s18  ;;  %v3668_v26 = vpop.eup %3667 }
0x120d   :  { %v2148_v27 = vadd.f32 1.0, %v3668_v26 }
0x120f   :  { %3669 = vrcp.f32 %v2148_v27 }
0x1210   :  { %3671 = vpow2.f32 %v3109_v28 }
0x1219   :  { %v3670_v29 = vpop.eup %3669 }
0x121a   :  { %v3672_v32 = vpop.eup %3671  ;;  %v2152_v35 = vmul.f32 %v3670_v29, %v4164_v45 }
0x121b   :  { %v2313_v33 = vadd.f32 1.0, %v3672_v32 }
0x121d   :  { %3673 = vrcp.f32 %v2313_v33 }
0x1227   :  { %v3674_v6 = vpop.eup %3673 }
0x1228   :  { %v2317_v39 = vmul.f32 %v3674_v6, %v4169_v61 }
0x1266   :  { %v2155_v30 = vpop.permute.xlu0 %2154 }
0x1267   :  { %v2157_v31 = vmul.f32 %v3670_v29, %v2155_v30  ;;  %v2678_v30 = vld [vmem:[%s4341_s8 + $0x68] sm:$0xff] }
0x1269   :  { %2159 = vrot.lane.b32.xlu0 %v2157_v31, %s3758_s19 }
0x127e   :  { %v2320_v34 = vpop.permute.xlu1 %2319 }
0x127f   :  { %v2322_v12 = vmul.f32 %v3674_v6, %v2320_v34 }
0x1281   :  { %2324 = vrot.lane.b32.xlu1 %v2322_v12, %s3758_s19 }
0x12db   :  { %v2160_v54 = vpop.permute.xlu0 %2159 }
0x12dc   :  { %v4211_v36 = vadd.f32 %v2160_v54, %v2152_v35 }
0x12de   :  { %3675 = vtanh.f32 %v4211_v36 }
0x12e8   :  { %v3676_v37 = vpop.eup %3675 }
0x12e9   :  { %2165 = vrot.lane.b32.xlu0 %v3676_v37, %s3758_s19 }
0x12f3   :  { %v2325_v41 = vpop.permute.xlu1 %2324 }
0x12f4   :  { %v4216_v40 = vadd.f32 %v2325_v41, %v2317_v39 }
0x12f6   :  { %3677 = vtanh.f32 %v4216_v40 }
0x1300   :  { %v3678_v43 = vpop.eup %3677 }
0x1301   :  { %2330 = vrot.lane.b32.xlu1 %v3678_v43, %s3758_s19 }
0x135b   :  { %v2166_v48 = vpop.permute.xlu0 %2165 }
0x135c   :  { %v2168_v55 = vmul.f32 %v3670_v29, %v2166_v48  ;;  %v2677_v29 = vld [vmem:[%s4341_s8 + $0x60] sm:$0xff] }
0x135d   :  { %v3550_v31 = vpack.c.bf16 %v2678_v30, %v2677_v29 }
0x135e   :  { %2413 = vrot.lane.b32.xlu1 %v2168_v55, %s3759_s20 }
0x1373   :  { %v2331_v50 = vpop.permute.xlu1 %2330 }
0x1374   :  { %v2333_v51 = vmul.f32 %v3674_v6, %v2331_v50 }
0x1376   :  { %2337 = vrot.lane.b32.xlu0 %v2333_v51, %s3759_s20 }
0x13d0   :  { %v2414_v53 = vpop.permute.xlu1 %2413 }
0x13d1   :  { %3421 = vmatmul.mubr.msk.f32.vlgmr.msra.gmra.mrb[28].mxu1 %vm251_vm2, %v2414_v53 }
0x13d2   :  { %3548 = vmatpush3.bf16.msra.mxu1 %v3902_v42  ;;  %3434 = vmatprep.mubr.msk.f32.mxu1 %vm3755_vm0, %v3756_v9 }
0x13d3   :  { %3552 = vmatprep.subr.bf16.mxu1 %v3754_v8 }
0x13d5   :  { %3435 = vmatmul.mubr.msk.f32.vlgmr.msra.gmra.mrb[30].mxu1 %vm251_vm2, %v2414_v53 }
0x13d6   :  { %3554 = vmatpush3.bf16.msra.mxu1 %v3890_v38  ;;  %3448 = vmatprep.mubr.msk.f32.mxu1 %vm3755_vm0, %v3756_v9 }
0x13d7   :  { %3558 = vmatprep.subr.bf16.mxu1 %v3754_v8 }
0x13e8   :  { %v2338_v45 = vpop.permute.xlu0 %2337 }
0x13e9   :  { %3414 = vmatmul.mubr.msk.f32.vlgmr.msra.gmra.mrb[28].mxu0 %vm251_vm2, %v2338_v45 }
0x13ea   :  { %3545 = vmatpush3.bf16.msra.mxu0 %v3890_v38  ;;  %3427 = vmatprep.mubr.msk.f32.mxu0 %vm3755_vm0, %v3756_v9 }
0x13eb   :  { %3549 = vmatprep.subr.bf16.mxu0 %v3754_v8 }
0x13ed   :  { %3428 = vmatmul.mubr.msk.f32.vlgmr.msra.gmra.mrb[30].mxu0 %vm251_vm2, %v2338_v45 }
0x13ee   :  { %3441 = vmatprep.mubr.msk.f32.mxu0 %vm3755_vm0, %v3756_v9  ;;  %3551 = vmatpush3.bf16.msra.mxu0 %v3550_v31 }
0x13ef   :  { %3555 = vmatprep.subr.bf16.mxu0 %v3754_v8 }
0x14a4   :  { %v2483_v60 = vpop.f32.mrb[28].mxu1 }
0x14a5   :  { %v2487_v61 = vadd.f32 %v2483_v60, %v241_v59  ;;  %v3422_v62 = vpop.f32.mrb[29].mxu1  ;;  %v2925_v59 = vld [vmem:[%s4341_s8 + $0x70] sm:$0xff]  ;;  %v2926_v60 = vld [vmem:[%s4341_s8 + $0x78] sm:$0xff]  ;;  %s3761_s8 = smov [#allocation3]  }
0x14a7   :  { %3679 = vtanh.f32 %v2487_v61  ;;  %v3112_v7 = vmul.f32 -1.442695, %v2487_v61  ;;  %v3559_v61 = vpack.c.bf16 %v2926_v60, %v2925_v59 }
0x14a8   :  { %v2648_v38 = vpop.f32.mrb[30].mxu1 }
0x14a9   :  { %v3436_v63 = vpop.f32.mrb[31].mxu1 }
0x14b1   :  { %v3680_v0 = vpop.eup %3679 }
0x14b2   :  { %2497 = vrot.lane.b32.xlu1 %v3680_v0, %s3757_s18 }
0x14bc   :  { %v2407_v1 = vpop.f32.mrb[28].mxu0 }
0x14bd   :  { %v2411_v52 = vadd.f32 %v2407_v1, %v4204_v20  ;;  %v3415_v2 = vpop.f32.mrb[29].mxu0 }
0x14c0   :  { %v2578_v3 = vpop.f32.mrb[30].mxu0 }
0x14c1   :  { %v2649_v4 = vadd.f32 %v2648_v38, %v2578_v3  ;;  %v3429_v5 = vpop.f32.mrb[31].mxu0 }
0x14c3   :  { %v2652_v10 = vadd.f32 %v3919_v49, %v2649_v4 }
0x14c5   :  { %3681 = vtanh.f32 %v2652_v10  ;;  %v3115_v14 = vmul.f32 -1.442695, %v2652_v10 }
0x14c6   :  { %3683 = vpow2.f32 %v3112_v7 }
0x14cf   :  { %v3682_v56 = vpop.eup %3681 }
0x14d0   :  { %2662 = vrot.lane.b32.xlu0 %v3682_v56, %s3757_s18  ;;  %v3684_v11 = vpop.eup %3683 }
0x14d1   :  { %v2491_v13 = vadd.f32 1.0, %v3684_v11 }
0x14d3   :  { %3685 = vrcp.f32 %v2491_v13 }
0x14d4   :  { %3687 = vpow2.f32 %v3115_v14 }
0x14dd   :  { %v3686_v15 = vpop.eup %3685 }
0x14de   :  { %v3688_v19 = vpop.eup %3687  ;;  %v2495_v23 = vmul.f32 %v3686_v15, %v4211_v36 }
0x14df   :  { %v2656_v20 = vadd.f32 1.0, %v3688_v19 }
0x14e1   :  { %3689 = vrcp.f32 %v2656_v20 }
0x14eb   :  { %v3690_v49 = vpop.eup %3689 }
0x14ec   :  { %v2660_v57 = vmul.f32 %v3690_v49, %v4216_v40 }
0x1524   :  { %v2498_v16 = vpop.permute.xlu1 %2497 }
0x1525   :  { %v2500_v17 = vmul.f32 %v3686_v15, %v2498_v16 }
0x1527   :  { %2502 = vrot.lane.b32.xlu1 %v2500_v17, %s3758_s19 }
0x1542   :  { %v2663_v21 = vpop.permute.xlu0 %2662 }
0x1543   :  { %v2665_v22 = vmul.f32 %v3690_v49, %v2663_v21 }
0x1545   :  { %2667 = vrot.lane.b32.xlu0 %v2665_v22, %s3758_s19 }
0x1599   :  { %v2503_v24 = vpop.permute.xlu1 %2502 }
0x159a   :  { %v2505_v25 = vadd.f32 %v2503_v24, %v2495_v23 }
0x159c   :  { %3691 = vtanh.f32 %v2505_v25 }
0x15a6   :  { %v3692_v18 = vpop.eup %3691 }
0x15a7   :  { %2508 = vrot.lane.b32.xlu1 %v3692_v18, %s3758_s19 }
0x15b7   :  { %v2668_v26 = vpop.permute.xlu0 %2667 }
0x15b8   :  { %v2670_v27 = vadd.f32 %v2668_v26, %v2660_v57 }
0x15ba   :  { %3693 = vtanh.f32 %v2670_v27 }
0x15c4   :  { %v3694_v28 = vpop.eup %3693 }
0x15c5   :  { %2673 = vrot.lane.b32.xlu0 %v3694_v28, %s3758_s19 }
0x1619   :  { %v2509_v32 = vpop.permute.xlu1 %2508 }
0x161a   :  { %v2511_v33 = vmul.f32 %v3686_v15, %v2509_v32 }
0x161c   :  { %2826 = vrot.lane.b32.xlu1 %v2511_v33, %s3759_s20 }
0x1637   :  { %v2674_v6 = vpop.permute.xlu0 %2673 }
0x1638   :  { %v2676_v34 = vmul.f32 %v3690_v49, %v2674_v6 }
0x163a   :  { %2680 = vrot.lane.b32.xlu0 %v2676_v34, %s3759_s20 }
0x168e   :  { %v2827_v12 = vpop.permute.xlu1 %2826 }
0x168f   :  { %3014 = vst.msk [vmem:[#allocation3] sm:$0xff] %vm251_vm2, %v2827_v12 }
0x16ac   :  { %v2681_v35 = vpop.permute.xlu0 %2680 }
0x16ad   :  { %3442 = vmatmul.mubr.msk.f32.vlgmr.msra.gmra.mrb[32].mxu0 %vm251_vm2, %v2681_v35  ;;  %3449 = vmatmul.mubr.msk.f32.vlgmr.msra.gmra.mrb[32].mxu1 %vm251_vm2, %v2681_v35 }
0x16ae   :  { %3557 = vmatpush3.bf16.msra.mxu0 %v3902_v42  ;;  %3455 = vmatprep.mubr.msk.f32.mxu0 %vm3755_vm0, %v3756_v9  ;;  %v3704_v42 = vld [vmem:[%s4340_s7] ss:$0 sm:$0xff] }
0x16af   :  { %3462 = vmatprep.mubr.msk.f32.mxu1 %vm3755_vm0, %v3756_v9  ;;  %3560 = vmatpush3.bf16.msra.mxu1 %v3559_v61 }
0x16b1   :  { %3456 = vmatmul.mubr.msk.f32.vlgmr.msra.gmra.mrb[34].mxu0 %vm251_vm2, %v2827_v12 }
0x1780   :  { %v2750_v8 = vpop.f32.mrb[32].mxu0  ;;  %v2821_v54 = vpop.f32.mrb[32].mxu1 }
0x1781   :  { %v4279_v36 = vadd.f32 %v2750_v8, %v2411_v52  ;;  %v3443_v37 = vpop.f32.mrb[33].mxu0  ;;  %v3450_v39 = vpop.f32.mrb[33].mxu1 }
0x1784   :  { %v2896_v41 = vpop.f32.mrb[34].mxu0 }
0x1785   :  { %v2897_v40 = vadd.f32 %v2896_v41, %v2821_v54  ;;  %v3457_v43 = vpop.f32.mrb[35].mxu0 }
0x1787   :  { %v2900_v44 = vadd.f32 %v3704_v42, %v2897_v40 }
0x1789   :  { %3695 = vtanh.f32 %v2900_v44  ;;  %v3119_v9 = vmul.f32 -1.442695, %v2900_v44 }
0x178b   :  { %3697 = vpow2.f32 %v3119_v9 }
0x1793   :  { %v3696_v46 = vpop.eup %3695 }
0x1794   :  { %2910 = vrot.lane.b32.xlu0 %v3696_v46, %s3757_s18 }
0x1795   :  { %v3698_v47 = vpop.eup %3697 }
0x1796   :  { %v2904_v48 = vadd.f32 1.0, %v3698_v47 }
0x1798   :  { %3699 = vrcp.f32 %v2904_v48 }
0x17a2   :  { %v3700_v55 = vpop.eup %3699 }
0x17a3   :  { %v2908_v53 = vmul.f32 %v3700_v55, %v2670_v27 }
0x1806   :  { %v2911_v50 = vpop.permute.xlu0 %2910 }
0x1807   :  { %v2913_v51 = vmul.f32 %v3700_v55, %v2911_v50 }
0x1809   :  { %2915 = vrot.lane.b32.xlu1 %v2913_v51, %s3758_s19 }
0x187b   :  { %v2916_v45 = vpop.permute.xlu1 %2915 }
0x187c   :  { %v2918_v58 = vadd.f32 %v2916_v45, %v2908_v53 }
0x187e   :  { %3701 = vtanh.f32 %v2918_v58 }
0x1888   :  { %v3702_v62 = vpop.eup %3701 }
0x1889   :  { %2921 = vrot.lane.b32.xlu0 %v3702_v62, %s3758_s19  ;;  %s3036_s19 = sshll.u32 %s3761_s8, 4  ;;  %s3037_s19 = int_to_ptr.vmem [resolvable:$true] %s3036_s19 }
0x188a   :  { %p3710_p1 = scmp.lt.s32.totalorder %s3037_s19, %s3037_s19 }
0x188d   :  { %3019 = vrot.lane.b32.xlu0 %v2505_v25, %s3760_s24 }
0x18fb   :  { %v2922_v38 = vpop.permute.xlu0 %2921 }
0x18fc   :  { %v2924_v63 = vmul.f32 %v3700_v55, %v2922_v38 }
0x18fe   :  { %2928 = vrot.lane.b32.xlu1 %v2924_v63, %s3759_s20  ;;  %s3705_s20 = scalar_lea.vmem %s3037_s19, 256 }
0x18ff   :  { %v3020_v0 = vpop.permute.xlu0 %3019  ;;  %p3706_p0 = scmp.ne.s32.totalorder %s3037_s19, %s3705_s20  ;;  %p3711_p2 = scmp.lt.s32.totalorder %s3705_s20, %s3705_s20 }
0x1900   :  { %3022 = vst.msk [vmem:[#allocation5] sm:$0xff] %vm251_vm2, %v3020_v0 }
0x1901   :  { %p3712_p3 = por %p3711_p2, %p3710_p1 }
0x1902   :  { %3024 = vrot.lane.b32.xlu1 %v2918_v58, %s3760_s24 }
0x1903   :  { %p3713_p4 = pnand %p3712_p3, %p3706_p0 }
0x1970   :  { %v2929_v1 = vpop.permute.xlu1 %2928 }
0x1971   :  { %3017 = vst.msk [vmem:[#allocation3 + $0x8] sm:$0xff] %vm251_vm2, %v2929_v1  ;;  %3463 = vmatmul.mubr.msk.f32.vlgmr.msra.gmra.mrb[34].mxu1 %vm251_vm2, %v2929_v1 }
0x1974   :  { %v3025_v52 = vpop.permute.xlu1 %3024 }
0x1975   :  { %3028 = vst.msk [vmem:[#allocation5 + $0x8] sm:$0xff] %vm251_vm2, %v3025_v52 }
0x1976   :  { %3716 = shalt.err (!%p3713_p4)
}
0x1977   :  { %s3717_s28 = scalar_lea.hbm %s4344_s11, 256 }
0x1978   :  { %p3718_p5 = scmp.ne.s32.totalorder %s4344_s11, %s3717_s28  ;;  %p3721_p6 = scmp.lt.u32.totalorder %s3717_s28, %s4344_s11 }
0x197a   :  { %p3723_p7 = pnand %p3721_p6, %p3718_p5 }
0x197c   :  { %3726 = shalt.err (!%p3723_p7)
}
0x197d   :  { %s3763_s30 = smov 128   ;;  %s3764_s13 = smov 8  }
0x197e   :  { %3042 = dma.vmem_to_hbm [thread:$0]  %s3037_s19, 256, %s4344_s11, [#allocation4], %s3763_s30, %s3763_s30, %s3764_s13  }
0x197f   :  { %s3727_s14 = scalar_lea.vmem %s4298_s1, 256  ;;  %p3732_p9 = scmp.lt.s32.totalorder %s4298_s1, %s4298_s1 }
0x1980   :  { %p3728_p8 = scmp.ne.s32.totalorder %s4298_s1, %s3727_s14  ;;  %p3733_p10 = scmp.lt.s32.totalorder %s3727_s14, %s3727_s14 }
0x1982   :  { %p3734_p11 = por %p3733_p10, %p3732_p9 }
0x1984   :  { %p3735_p12 = pnand %p3734_p11, %p3728_p8 }
0x1986   :  { %3738 = shalt.err (!%p3735_p12)
}
0x1987   :  { %s3739_s15 = scalar_lea.hbm %s4345_s12, 256 }
0x1988   :  { %p3740_p13 = scmp.ne.s32.totalorder %s4345_s12, %s3739_s15  ;;  %p3743_p0 = scmp.lt.u32.totalorder %s3739_s15, %s4345_s12 }
0x198a   :  { %p3745_p1 = pnand %p3743_p0, %p3740_p13 }
0x198c   :  { %3748 = shalt.err (!%p3745_p1)
}
0x198d   :  { %3054 = dma.vmem_to_hbm [thread:$0]  %s4298_s1, 256, %s4345_s12, [#allocation6], %s3763_s30, %s3763_s30, %s3764_s13   ;;  %v3121_v3 = vld [vmem:[#allocation2] ss:$0 sm:$0xff]  ;;  %vm3011_vm3 = vcmask 7168  }
0x1a44   :  { %v2998_v2 = vpop.f32.mrb[34].mxu1 }
0x1a45   :  { %v3002_v4 = vadd.f32 %v2998_v2, %v4279_v36  ;;  %v3464_v5 = vpop.f32.mrb[35].mxu1 }
0x1a47   :  { %v3010_v10 = vadd.f32 %v3121_v3, %v3002_v4 }
0x1a49   :  { %3012 = vst.msk [vmem:[%s4343_s10] sm:$0xff] %vm3011_vm3, %v3010_v10 }
0x1a4a   :  { %3749 = dma.done.wait [#allocation4], 256  }
0x1a4b   :  { %3750 = vsyncadd [#allocation4], 4294967040 }
0x1a4c   :  { %3751 = dma.done.wait [#allocation6], 256  }
0x1a4d   :  { %3752 = vsyncadd [#allocation6], 4294967040 }
0x1a4e   :  { %3063 = vsyncpa [#allocation4], 1 }
0x1a4f   :  { %3064 = vsyncpa [#allocation6], 1 }

</bundles_post_ra>
